<compile_context>
chip_gen: v7x
topology: tpu7x:2x2x1
jax: 0.10.0
libtpu: 0.0.40
codegen_flags: <defaults>
</compile_context>

<pallas_src>
import numpy as np
import jax
import jax.numpy as jnp
from jax import lax
from jax.experimental import pallas as pl
from jax.experimental.pallas import tpu as pltpu


# ----------------------------------------------------------------------------
# Bilinear (align_corners=True) interpolation matrix (static / trace-time).
# ----------------------------------------------------------------------------
def _interp_matrix(in_size, out_size):
    m = np.zeros((out_size, in_size), dtype=np.float32)
    for i in range(out_size):
        src = 0.0 if out_size == 1 else i * (in_size - 1) / (out_size - 1)
        lo = min(int(np.floor(src)), in_size - 1)
        hi = min(lo + 1, in_size - 1)
        t = float(src - lo)
        m[i, lo] += 1.0 - t
        m[i, hi] += t
    return m


# ----------------------------------------------------------------------------
# Pallas kernel: one batch element per grid step; everything stays in VMEM.
# ----------------------------------------------------------------------------
def make_fusion_kernel(H, W, C, compute_dtype):
    WC = W * C

    def kernel(x_ref, prev_ref, m1_ref, m2_ref, m3_ref, m4_ref,
               sb_ref, sdn_ref, sup_ref, uh_ref, pw_ref, bias_ref, o_ref):
        sdn = sdn_ref[...]            # (H, H): row y <- row y-1 (row 0 -> zeros)
        sup = sup_ref[...]            # (H, H): row y <- row y+1 (row H-1 -> zeros)

        def mm(a, b):
            return jnp.dot(a.astype(compute_dtype), b.astype(compute_dtype),
                           preferred_element_type=jnp.float32)

        def conv3x3(a, m_ref):
            # a: (H, WC); m_ref: (WC, 3*WC) = [M_dy0 | M_dy1 | M_dy2]
            y = mm(a, m_ref[...])                      # single big MXU dot
            y_top = y[:, 0 * WC:1 * WC]                # contribution of row y-1
            y_mid = y[:, 1 * WC:2 * WC]                # contribution of row y
            y_bot = y[:, 2 * WC:3 * WC]                # contribution of row y+1
            return mm(sdn, y_top) + y_mid + mm(sup, y_bot)

        def block_core(xin, mA_ref, mB_ref, sA, bA, sB, bB):
            a1 = jnp.maximum(xin, 0.0)
            y1 = conv3x3(a1, mA_ref) * sA + bA         # conv -> BN (folded)
            a2 = jnp.maximum(y1, 0.0)
            return conv3x3(a2, mB_ref) * sB + bB       # conv -> BN (folded)

        x = x_ref[0]                                   # (H, WC)
        prev = prev_ref[0]                             # (H, WC)

        # ResidualConvBlock 1; residual add and +previous_feature fused.
        y2_1 = block_core(x, m1_ref, m2_ref,
                          sb_ref[0], sb_ref[1], sb_ref[2], sb_ref[3])
        f1 = y2_1 + x + prev

        # ResidualConvBlock 2.
        y2_2 = block_core(f1, m3_ref, m4_ref,
                          sb_ref[4], sb_ref[5], sb_ref[6], sb_ref[7])
        f2 = y2_2 + f1

        # x2 bilinear upsample fused with 1x1 projection:
        #   H-interp from the left, (W-interp o channel-projection) from the right.
        up_h = mm(uh_ref[...], f2)                         # (2H, WC)
        out = mm(up_h, pw_ref[...]) + bias_ref[...]        # (2H, 2*WC)
        o_ref[0] = out.astype(o_ref.dtype)                 # single lane-dense store

    return kernel


# ----------------------------------------------------------------------------
# Wrapper: NCHW -> lane-folded (N, H, W*C), parameter folding, pallas_call.
# ----------------------------------------------------------------------------
def fusion_block_forward(feature_nchw, prev_nchw, params, *, use_bf16_matmul=False):
    N, C, H, W = feature_nchw.shape
    WC = W * C
    compute_dtype = jnp.bfloat16 if use_bf16_matmul else jnp.float32

    x = jnp.transpose(feature_nchw, (0, 2, 3, 1)).reshape(N, H, WC).astype(jnp.float32)
    if prev_nchw is None:
        prev = jnp.zeros_like(x)
    else:
        prev = jnp.transpose(prev_nchw, (0, 2, 3, 1)).reshape(N, H, WC).astype(jnp.float32)

    def banded(w):
        # w: (Cout, Cin, 3, 3) OIHW  ->  (WC, 3*WC), columns [M_dy0 | M_dy1 | M_dy2]
        # M_dy[xin*C+ci, xout*C+co] = w[co, ci, dy, xin-xout+1]; x zero-padding implicit.
        mats = []
        for dy in range(3):
            m = jnp.zeros((WC, WC), jnp.float32)
            for dx in range(3):
                band = jnp.asarray(np.eye(W, k=1 - dx), jnp.float32)
                m = m + jnp.kron(band, jnp.transpose(w[:, :, dy, dx]).astype(jnp.float32))
            mats.append(m)
        return jnp.concatenate(mats, axis=1).astype(compute_dtype)

    def fold_bn(p):
        g, b, m, v = p
        s = g / jnp.sqrt(v + 1e-5)
        sh = b - m * s
        return (jnp.tile(s, W).reshape(1, WC).astype(jnp.float32),
                jnp.tile(sh, W).reshape(1, WC).astype(jnp.float32))

    b1p, b2p = params["block1"], params["block2"]
    m_b1c1, m_b1c2 = banded(b1p["w1"]), banded(b1p["w2"])
    m_b2c1, m_b2c2 = banded(b2p["w1"]), banded(b2p["w2"])
    s1a, t1a = fold_bn(b1p["bn1"])
    s2a, t2a = fold_bn(b1p["bn2"])
    s1b, t1b = fold_bn(b2p["bn1"])
    s2b, t2b = fold_bn(b2p["bn2"])
    sb = jnp.stack([s1a, t1a, s2a, t2a, s1b, t1b, s2b, t2b], axis=0)     # (8, 1, WC)

    sdn = jnp.asarray(np.eye(H, k=-1), compute_dtype)                    # row y <- y-1
    sup = jnp.asarray(np.eye(H, k=1), compute_dtype)                     # row y <- y+1
    uh = jnp.asarray(_interp_matrix(H, 2 * H)).astype(compute_dtype)     # (2H, H)
    uw = _interp_matrix(W, 2 * W)                                        # (2W, W) numpy
    wp = params["proj_w"][:, :, 0, 0]                                    # (Cout, Cin)
    pw = jnp.kron(jnp.asarray(uw.T),
                  jnp.transpose(wp).astype(jnp.float32)).astype(compute_dtype)  # (WC, 2W*C)
    bias = jnp.tile(params["proj_b"].astype(jnp.float32), 2 * W).reshape(1, 2 * WC)

    kernel = make_fusion_kernel(H, W, C, compute_dtype)

    def rep_spec(arr):
        shape = arr.shape
        zeros = (0,) * len(shape)
        return pl.BlockSpec(shape, lambda n, zeros=zeros: zeros)

    consts = [m_b1c1, m_b1c2, m_b2c1, m_b2c2, sb, sdn, sup, uh, pw, bias]
    in_specs = [pl.BlockSpec((1, H, WC), lambda n: (n, 0, 0)),
                pl.BlockSpec((1, H, WC), lambda n: (n, 0, 0))]
    in_specs += [rep_spec(c) for c in consts]

    out = pl.pallas_call(
        kernel,
        out_shape=jax.ShapeDtypeStruct((N, 2 * H, 2 * WC), jnp.float32),
        grid_spec=pltpu.PrefetchScalarGridSpec(
            num_scalar_prefetch=0,
            grid=(N,),
            in_specs=in_specs,
            out_specs=pl.BlockSpec((1, 2 * H, 2 * WC), lambda n: (n, 0, 0)),
        ),
        compiler_params=pltpu.CompilerParams(dimension_semantics=("parallel",)),
    )(x, prev, *consts)

    return out.reshape(N, 2 * H, 2 * W, C)                               # NHWC


# ----------------------------------------------------------------------------
# Pure-JAX reference (NCHW, mirrors the PyTorch module with eval-mode BN).
# ----------------------------------------------------------------------------
def reference_forward(x, prev, params):
    prec = lax.Precision.HIGHEST

    def conv3x3(x, w):
        return lax.conv_general_dilated(x, w, (1, 1), ((1, 1), (1, 1)),
                                        dimension_numbers=("NCHW", "OIHW", "NCHW"),
                                        precision=prec)

    def bn(x, p):
        g, b, m, v = p
        s = g / jnp.sqrt(v + 1e-5)
        return x * s[None, :, None, None] + (b - m * s)[None, :, None, None]

    def block(x, bp):
        r = x
        a = jax.nn.relu(x)
        y = bn(conv3x3(a, bp["w1"]), bp["bn1"])
        a2 = jax.nn.relu(y)
        y2 = bn(conv3x3(a2, bp["w2"]), bp["bn2"])
        return y2 + r

    f = block(x, params["block1"])
    f = f + prev
    f = block(f, params["block2"])
    N, C, H, W = f.shape
    Uh = jnp.asarray(_interp_matrix(H, 2 * H))
    Uw = jnp.asarray(_interp_matrix(W, 2 * W))
    f = jnp.einsum("ph,nchw->ncpw", Uh, f, precision=prec)   # (N, C, 2H, W)
    f = jnp.einsum("qw,ncpw->ncpq", Uw, f, precision=prec)   # (N, C, 2H, 2W)
    wp = params["proj_w"][:, :, 0, 0]
    f = jnp.einsum("oc,ncpq->nopq", wp, f, precision=prec)
    return f + params["proj_b"][None, :, None, None]


# ----------------------------------------------------------------------------
if __name__ == "__main__":
    N, C, H, W = 2, 8, 16, 16   # feature_dim = 8  ->  W*C = 128 (one lane group)

    key = jax.random.PRNGKey(0)
    keys = jax.random.split(key, 12)

    def conv_w(k):
        return 0.1 * jax.random.normal(k, (C, C, 3, 3), jnp.float32)

    def bn_p(k):
        k1, k2, k3, k4 = jax.random.split(k, 4)
        g = 1.0 + 0.1 * jax.random.normal(k1, (C,), jnp.float32)
        b = 0.1 * jax.random.normal(k2, (C,), jnp.float32)
        m = 0.1 * jax.random.normal(k3, (C,), jnp.float32)
        v = 0.5 + jax.random.uniform(k4, (C,), jnp.float32)
        return (g, b, m, v)

    params = {
        "block1": {"w1": conv_w(keys[0]), "bn1": bn_p(keys[1]),
                   "w2": conv_w(keys[2]), "bn2": bn_p(keys[3])},
        "block2": {"w1": conv_w(keys[4]), "bn1": bn_p(keys[5]),
                   "w2": conv_w(keys[6]), "bn2": bn_p(keys[7])},
        "proj_w": 0.1 * jax.random.normal(keys[8], (C, C, 1, 1), jnp.float32),
        "proj_b": 0.1 * jax.random.normal(keys[9], (C,), jnp.float32),
    }

    feature = jax.random.normal(keys[10], (N, C, H, W), jnp.float32)
    previous_feature = jax.random.normal(keys[11], (N, C, H, W), jnp.float32)

    out_nhwc = fusion_block_forward(feature, previous_feature, params)
    out_nhwc = jax.block_until_ready(out_nhwc)

    ref_nchw = reference_forward(feature, previous_feature, params)
    ref_nhwc = jnp.transpose(ref_nchw, (0, 2, 3, 1))

    assert out_nhwc.shape == (N, 2 * H, 2 * W, C)
    assert bool(jnp.all(jnp.isfinite(out_nhwc)))
    max_err = float(jnp.max(jnp.abs(out_nhwc - ref_nhwc)))
    assert bool(jnp.allclose(out_nhwc, ref_nhwc, rtol=2e-3, atol=2e-3)), max_err

    print("KERNEL_OK")
</pallas_src>

<mosaic_0001>
module attributes {stable_mosaic.version = 11 : i64} {
  func.func @kernel(%arg0: i32, %arg1: memref<1x16x128xf32, #tpu.memory_space<vmem>>, %arg2: memref<1x16x128xf32, #tpu.memory_space<vmem>>, %arg3: memref<128x384xf32, #tpu.memory_space<vmem>>, %arg4: memref<128x384xf32, #tpu.memory_space<vmem>>, %arg5: memref<128x384xf32, #tpu.memory_space<vmem>>, %arg6: memref<128x384xf32, #tpu.memory_space<vmem>>, %arg7: memref<8x1x128xf32, #tpu.memory_space<vmem>>, %arg8: memref<16x16xf32, #tpu.memory_space<vmem>>, %arg9: memref<16x16xf32, #tpu.memory_space<vmem>>, %arg10: memref<32x16xf32, #tpu.memory_space<vmem>>, %arg11: memref<128x256xf32, #tpu.memory_space<vmem>>, %arg12: memref<1x256xf32, #tpu.memory_space<vmem>>, %arg13: memref<1x32x256xf32, #tpu.memory_space<vmem>>) attributes {dimension_semantics = [#tpu.dimension_semantics<parallel>], iteration_bounds = array<i64: 2>, scalar_prefetch = 0 : i64, scratch_operands = 0 : i64, tpu.core_type = #tpu.core_type<tc>, window_params = [{transform_indices = @transform_0, window_bounds = array<i64: 1, 16, 128>}, {transform_indices = @transform_1, window_bounds = array<i64: 1, 16, 128>}, {pipeline_mode = #tpu.pipeline_mode<synchronous>, transform_indices = @transform_2, window_bounds = array<i64: 128, 384>}, {pipeline_mode = #tpu.pipeline_mode<synchronous>, transform_indices = @transform_3, window_bounds = array<i64: 128, 384>}, {pipeline_mode = #tpu.pipeline_mode<synchronous>, transform_indices = @transform_4, window_bounds = array<i64: 128, 384>}, {pipeline_mode = #tpu.pipeline_mode<synchronous>, transform_indices = @transform_5, window_bounds = array<i64: 128, 384>}, {pipeline_mode = #tpu.pipeline_mode<synchronous>, transform_indices = @transform_6, window_bounds = array<i64: 8, 1, 128>}, {pipeline_mode = #tpu.pipeline_mode<synchronous>, transform_indices = @transform_7, window_bounds = array<i64: 16, 16>}, {pipeline_mode = #tpu.pipeline_mode<synchronous>, transform_indices = @transform_8, window_bounds = array<i64: 16, 16>}, {pipeline_mode = #tpu.pipeline_mode<synchronous>, transform_indices = @transform_9, window_bounds = array<i64: 32, 16>}, {pipeline_mode = #tpu.pipeline_mode<synchronous>, transform_indices = @transform_10, window_bounds = array<i64: 128, 256>}, {pipeline_mode = #tpu.pipeline_mode<synchronous>, transform_indices = @transform_11, window_bounds = array<i64: 1, 256>}, {transform_indices = @transform_12, window_bounds = array<i64: 1, 32, 256>}]} {
    %c0 = arith.constant 0 : index
    %c0_0 = arith.constant 0 : index
    %0 = vector.load %arg8[%c0, %c0_0] : memref<16x16xf32, #tpu.memory_space<vmem>>, vector<16x16xf32>
    %c0_1 = arith.constant 0 : index
    %c0_2 = arith.constant 0 : index
    %1 = vector.load %arg9[%c0_1, %c0_2] : memref<16x16xf32, #tpu.memory_space<vmem>>, vector<16x16xf32>
    %c0_3 = arith.constant 0 : index
    %c0_4 = arith.constant 0 : index
    %c0_5 = arith.constant 0 : index
    %2 = vector.load %arg1[%c0_3, %c0_4, %c0_5] : memref<1x16x128xf32, #tpu.memory_space<vmem>>, vector<1x16x128xf32>
    %3 = vector.shape_cast %2 : vector<1x16x128xf32> to vector<16x128xf32>
    %c0_6 = arith.constant 0 : index
    %c0_7 = arith.constant 0 : index
    %c0_8 = arith.constant 0 : index
    %4 = vector.load %arg2[%c0_6, %c0_7, %c0_8] : memref<1x16x128xf32, #tpu.memory_space<vmem>>, vector<1x16x128xf32>
    %5 = vector.shape_cast %4 : vector<1x16x128xf32> to vector<16x128xf32>
    %c0_9 = arith.constant 0 : index
    %c0_10 = arith.constant 0 : index
    %c0_11 = arith.constant 0 : index
    %6 = vector.load %arg7[%c0_9, %c0_10, %c0_11] : memref<8x1x128xf32, #tpu.memory_space<vmem>>, vector<1x1x128xf32>
    %7 = vector.shape_cast %6 : vector<1x1x128xf32> to vector<1x128xf32>
    %c1 = arith.constant 1 : index
    %c0_12 = arith.constant 0 : index
    %c0_13 = arith.constant 0 : index
    %8 = vector.load %arg7[%c1, %c0_12, %c0_13] : memref<8x1x128xf32, #tpu.memory_space<vmem>>, vector<1x1x128xf32>
    %9 = vector.shape_cast %8 : vector<1x1x128xf32> to vector<1x128xf32>
    %c2 = arith.constant 2 : index
    %c0_14 = arith.constant 0 : index
    %c0_15 = arith.constant 0 : index
    %10 = vector.load %arg7[%c2, %c0_14, %c0_15] : memref<8x1x128xf32, #tpu.memory_space<vmem>>, vector<1x1x128xf32>
    %11 = vector.shape_cast %10 : vector<1x1x128xf32> to vector<1x128xf32>
    %c3 = arith.constant 3 : index
    %c0_16 = arith.constant 0 : index
    %c0_17 = arith.constant 0 : index
    %12 = vector.load %arg7[%c3, %c0_16, %c0_17] : memref<8x1x128xf32, #tpu.memory_space<vmem>>, vector<1x1x128xf32>
    %13 = vector.shape_cast %12 : vector<1x1x128xf32> to vector<1x128xf32>
    %cst = arith.constant 0.000000e+00 : f32
    %14 = vector.broadcast %cst : f32 to vector<16x128xf32>
    %15 = arith.maximumf %3, %14 : vector<16x128xf32>
    %c0_18 = arith.constant 0 : index
    %c0_19 = arith.constant 0 : index
    %16 = vector.load %arg3[%c0_18, %c0_19] : memref<128x384xf32, #tpu.memory_space<vmem>>, vector<128x384xf32>
    %cst_20 = arith.constant dense<0.000000e+00> : vector<16x384xf32>
    %17 = tpu.matmul %15, %16, %cst_20 {dimension_numbers = #tpu.dot_dimension_numbers<[1], [0], [0], [1], [0, 0, 1, 1], [], []>} : vector<16x128xf32>, vector<128x384xf32>, vector<16x384xf32> -> vector<16x384xf32>
    %18 = vector.extract_strided_slice %17 {offsets = [0, 0], sizes = [16, 128], strides = [1, 1]} : vector<16x384xf32> to vector<16x128xf32>
    %19 = vector.extract_strided_slice %17 {offsets = [0, 128], sizes = [16, 128], strides = [1, 1]} : vector<16x384xf32> to vector<16x128xf32>
    %20 = vector.extract_strided_slice %17 {offsets = [0, 256], sizes = [16, 128], strides = [1, 1]} : vector<16x384xf32> to vector<16x128xf32>
    %cst_21 = arith.constant dense<0.000000e+00> : vector<16x128xf32>
    %21 = tpu.matmul %0, %18, %cst_21 {dimension_numbers = #tpu.dot_dimension_numbers<[1], [0], [0], [1], [0, 0, 1, 1], [], []>} : vector<16x16xf32>, vector<16x128xf32>, vector<16x128xf32> -> vector<16x128xf32>
    %22 = arith.addf %21, %19 : vector<16x128xf32>
    %cst_22 = arith.constant dense<0.000000e+00> : vector<16x128xf32>
    %23 = tpu.matmul %1, %20, %cst_22 {dimension_numbers = #tpu.dot_dimension_numbers<[1], [0], [0], [1], [0, 0, 1, 1], [], []>} : vector<16x16xf32>, vector<16x128xf32>, vector<16x128xf32> -> vector<16x128xf32>
    %24 = arith.addf %22, %23 : vector<16x128xf32>
    %25 = vector.broadcast %7 : vector<1x128xf32> to vector<16x128xf32>
    %26 = arith.mulf %24, %25 : vector<16x128xf32>
    %27 = vector.broadcast %9 : vector<1x128xf32> to vector<16x128xf32>
    %28 = arith.addf %26, %27 : vector<16x128xf32>
    %cst_23 = arith.constant 0.000000e+00 : f32
    %29 = vector.broadcast %cst_23 : f32 to vector<16x128xf32>
    %30 = arith.maximumf %28, %29 : vector<16x128xf32>
    %c0_24 = arith.constant 0 : index
    %c0_25 = arith.constant 0 : index
    %31 = vector.load %arg4[%c0_24, %c0_25] : memref<128x384xf32, #tpu.memory_space<vmem>>, vector<128x384xf32>
    %cst_26 = arith.constant dense<0.000000e+00> : vector<16x384xf32>
    %32 = tpu.matmul %30, %31, %cst_26 {dimension_numbers = #tpu.dot_dimension_numbers<[1], [0], [0], [1], [0, 0, 1, 1], [], []>} : vector<16x128xf32>, vector<128x384xf32>, vector<16x384xf32> -> vector<16x384xf32>
    %33 = vector.extract_strided_slice %32 {offsets = [0, 0], sizes = [16, 128], strides = [1, 1]} : vector<16x384xf32> to vector<16x128xf32>
    %34 = vector.extract_strided_slice %32 {offsets = [0, 128], sizes = [16, 128], strides = [1, 1]} : vector<16x384xf32> to vector<16x128xf32>
    %35 = vector.extract_strided_slice %32 {offsets = [0, 256], sizes = [16, 128], strides = [1, 1]} : vector<16x384xf32> to vector<16x128xf32>
    %cst_27 = arith.constant dense<0.000000e+00> : vector<16x128xf32>
    %36 = tpu.matmul %0, %33, %cst_27 {dimension_numbers = #tpu.dot_dimension_numbers<[1], [0], [0], [1], [0, 0, 1, 1], [], []>} : vector<16x16xf32>, vector<16x128xf32>, vector<16x128xf32> -> vector<16x128xf32>
    %37 = arith.addf %36, %34 : vector<16x128xf32>
    %cst_28 = arith.constant dense<0.000000e+00> : vector<16x128xf32>
    %38 = tpu.matmul %1, %35, %cst_28 {dimension_numbers = #tpu.dot_dimension_numbers<[1], [0], [0], [1], [0, 0, 1, 1], [], []>} : vector<16x16xf32>, vector<16x128xf32>, vector<16x128xf32> -> vector<16x128xf32>
    %39 = arith.addf %37, %38 : vector<16x128xf32>
    %40 = vector.broadcast %11 : vector<1x128xf32> to vector<16x128xf32>
    %41 = arith.mulf %39, %40 : vector<16x128xf32>
    %42 = vector.broadcast %13 : vector<1x128xf32> to vector<16x128xf32>
    %43 = arith.addf %41, %42 : vector<16x128xf32>
    %44 = arith.addf %43, %3 : vector<16x128xf32>
    %45 = arith.addf %44, %5 : vector<16x128xf32>
    %c4 = arith.constant 4 : index
    %c0_29 = arith.constant 0 : index
    %c0_30 = arith.constant 0 : index
    %46 = vector.load %arg7[%c4, %c0_29, %c0_30] : memref<8x1x128xf32, #tpu.memory_space<vmem>>, vector<1x1x128xf32>
    %47 = vector.shape_cast %46 : vector<1x1x128xf32> to vector<1x128xf32>
    %c5 = arith.constant 5 : index
    %c0_31 = arith.constant 0 : index
    %c0_32 = arith.constant 0 : index
    %48 = vector.load %arg7[%c5, %c0_31, %c0_32] : memref<8x1x128xf32, #tpu.memory_space<vmem>>, vector<1x1x128xf32>
    %49 = vector.shape_cast %48 : vector<1x1x128xf32> to vector<1x128xf32>
    %c6 = arith.constant 6 : index
    %c0_33 = arith.constant 0 : index
    %c0_34 = arith.constant 0 : index
    %50 = vector.load %arg7[%c6, %c0_33, %c0_34] : memref<8x1x128xf32, #tpu.memory_space<vmem>>, vector<1x1x128xf32>
    %51 = vector.shape_cast %50 : vector<1x1x128xf32> to vector<1x128xf32>
    %c7 = arith.constant 7 : index
    %c0_35 = arith.constant 0 : index
    %c0_36 = arith.constant 0 : index
    %52 = vector.load %arg7[%c7, %c0_35, %c0_36] : memref<8x1x128xf32, #tpu.memory_space<vmem>>, vector<1x1x128xf32>
    %53 = vector.shape_cast %52 : vector<1x1x128xf32> to vector<1x128xf32>
    %cst_37 = arith.constant 0.000000e+00 : f32
    %54 = vector.broadcast %cst_37 : f32 to vector<16x128xf32>
    %55 = arith.maximumf %45, %54 : vector<16x128xf32>
    %c0_38 = arith.constant 0 : index
    %c0_39 = arith.constant 0 : index
    %56 = vector.load %arg5[%c0_38, %c0_39] : memref<128x384xf32, #tpu.memory_space<vmem>>, vector<128x384xf32>
    %cst_40 = arith.constant dense<0.000000e+00> : vector<16x384xf32>
    %57 = tpu.matmul %55, %56, %cst_40 {dimension_numbers = #tpu.dot_dimension_numbers<[1], [0], [0], [1], [0, 0, 1, 1], [], []>} : vector<16x128xf32>, vector<128x384xf32>, vector<16x384xf32> -> vector<16x384xf32>
    %58 = vector.extract_strided_slice %57 {offsets = [0, 0], sizes = [16, 128], strides = [1, 1]} : vector<16x384xf32> to vector<16x128xf32>
    %59 = vector.extract_strided_slice %57 {offsets = [0, 128], sizes = [16, 128], strides = [1, 1]} : vector<16x384xf32> to vector<16x128xf32>
    %60 = vector.extract_strided_slice %57 {offsets = [0, 256], sizes = [16, 128], strides = [1, 1]} : vector<16x384xf32> to vector<16x128xf32>
    %cst_41 = arith.constant dense<0.000000e+00> : vector<16x128xf32>
    %61 = tpu.matmul %0, %58, %cst_41 {dimension_numbers = #tpu.dot_dimension_numbers<[1], [0], [0], [1], [0, 0, 1, 1], [], []>} : vector<16x16xf32>, vector<16x128xf32>, vector<16x128xf32> -> vector<16x128xf32>
    %62 = arith.addf %61, %59 : vector<16x128xf32>
    %cst_42 = arith.constant dense<0.000000e+00> : vector<16x128xf32>
    %63 = tpu.matmul %1, %60, %cst_42 {dimension_numbers = #tpu.dot_dimension_numbers<[1], [0], [0], [1], [0, 0, 1, 1], [], []>} : vector<16x16xf32>, vector<16x128xf32>, vector<16x128xf32> -> vector<16x128xf32>
    %64 = arith.addf %62, %63 : vector<16x128xf32>
    %65 = vector.broadcast %47 : vector<1x128xf32> to vector<16x128xf32>
    %66 = arith.mulf %64, %65 : vector<16x128xf32>
    %67 = vector.broadcast %49 : vector<1x128xf32> to vector<16x128xf32>
    %68 = arith.addf %66, %67 : vector<16x128xf32>
    %cst_43 = arith.constant 0.000000e+00 : f32
    %69 = vector.broadcast %cst_43 : f32 to vector<16x128xf32>
    %70 = arith.maximumf %68, %69 : vector<16x128xf32>
    %c0_44 = arith.constant 0 : index
    %c0_45 = arith.constant 0 : index
    %71 = vector.load %arg6[%c0_44, %c0_45] : memref<128x384xf32, #tpu.memory_space<vmem>>, vector<128x384xf32>
    %cst_46 = arith.constant dense<0.000000e+00> : vector<16x384xf32>
    %72 = tpu.matmul %70, %71, %cst_46 {dimension_numbers = #tpu.dot_dimension_numbers<[1], [0], [0], [1], [0, 0, 1, 1], [], []>} : vector<16x128xf32>, vector<128x384xf32>, vector<16x384xf32> -> vector<16x384xf32>
    %73 = vector.extract_strided_slice %72 {offsets = [0, 0], sizes = [16, 128], strides = [1, 1]} : vector<16x384xf32> to vector<16x128xf32>
    %74 = vector.extract_strided_slice %72 {offsets = [0, 128], sizes = [16, 128], strides = [1, 1]} : vector<16x384xf32> to vector<16x128xf32>
    %75 = vector.extract_strided_slice %72 {offsets = [0, 256], sizes = [16, 128], strides = [1, 1]} : vector<16x384xf32> to vector<16x128xf32>
    %cst_47 = arith.constant dense<0.000000e+00> : vector<16x128xf32>
    %76 = tpu.matmul %0, %73, %cst_47 {dimension_numbers = #tpu.dot_dimension_numbers<[1], [0], [0], [1], [0, 0, 1, 1], [], []>} : vector<16x16xf32>, vector<16x128xf32>, vector<16x128xf32> -> vector<16x128xf32>
    %77 = arith.addf %76, %74 : vector<16x128xf32>
    %cst_48 = arith.constant dense<0.000000e+00> : vector<16x128xf32>
    %78 = tpu.matmul %1, %75, %cst_48 {dimension_numbers = #tpu.dot_dimension_numbers<[1], [0], [0], [1], [0, 0, 1, 1], [], []>} : vector<16x16xf32>, vector<16x128xf32>, vector<16x128xf32> -> vector<16x128xf32>
    %79 = arith.addf %77, %78 : vector<16x128xf32>
    %80 = vector.broadcast %51 : vector<1x128xf32> to vector<16x128xf32>
    %81 = arith.mulf %79, %80 : vector<16x128xf32>
    %82 = vector.broadcast %53 : vector<1x128xf32> to vector<16x128xf32>
    %83 = arith.addf %81, %82 : vector<16x128xf32>
    %84 = arith.addf %83, %45 : vector<16x128xf32>
    %c0_49 = arith.constant 0 : index
    %c0_50 = arith.constant 0 : index
    %85 = vector.load %arg10[%c0_49, %c0_50] : memref<32x16xf32, #tpu.memory_space<vmem>>, vector<32x16xf32>
    %cst_51 = arith.constant dense<0.000000e+00> : vector<32x128xf32>
    %86 = tpu.matmul %85, %84, %cst_51 {dimension_numbers = #tpu.dot_dimension_numbers<[1], [0], [0], [1], [0, 0, 1, 1], [], []>} : vector<32x16xf32>, vector<16x128xf32>, vector<32x128xf32> -> vector<32x128xf32>
    %c0_52 = arith.constant 0 : index
    %c0_53 = arith.constant 0 : index
    %87 = vector.load %arg11[%c0_52, %c0_53] : memref<128x256xf32, #tpu.memory_space<vmem>>, vector<128x256xf32>
    %cst_54 = arith.constant dense<0.000000e+00> : vector<32x256xf32>
    %88 = tpu.matmul %86, %87, %cst_54 {dimension_numbers = #tpu.dot_dimension_numbers<[1], [0], [0], [1], [0, 0, 1, 1], [], []>} : vector<32x128xf32>, vector<128x256xf32>, vector<32x256xf32> -> vector<32x256xf32>
    %c0_55 = arith.constant 0 : index
    %c0_56 = arith.constant 0 : index
    %89 = vector.load %arg12[%c0_55, %c0_56] : memref<1x256xf32, #tpu.memory_space<vmem>>, vector<1x256xf32>
    %90 = vector.broadcast %89 : vector<1x256xf32> to vector<32x256xf32>
    %91 = arith.addf %88, %90 : vector<32x256xf32>
    %c0_57 = arith.constant 0 : index
    %c0_58 = arith.constant 0 : index
    %c0_59 = arith.constant 0 : index
    %92 = vector.load %arg13[%c0_57, %c0_58, %c0_59] : memref<1x32x256xf32, #tpu.memory_space<vmem>>, vector<1x32x256xf32>
    %93 = vector.shape_cast %92 : vector<1x32x256xf32> to vector<32x256xf32>
    %94 = vector.shape_cast %91 : vector<32x256xf32> to vector<1x32x256xf32>
    tpu.vector_store %arg13[%c0_57, %c0_58, %c0_59], %94 {strides = array<i32>} : memref<1x32x256xf32, #tpu.memory_space<vmem>>, vector<1x32x256xf32>,
    return
  }
  func.func @transform_0(%arg0: i32) -> (i32, i32, i32) {
    %c0_i32 = arith.constant 0 : i32
    %c0_i32_0 = arith.constant 0 : i32
    %c0_i32_1 = arith.constant 0 : i32
    return %arg0, %c0_i32, %c0_i32_0 : i32, i32, i32
  }
  func.func @transform_1(%arg0: i32) -> (i32, i32, i32) {
    %c0_i32 = arith.constant 0 : i32
    %c0_i32_0 = arith.constant 0 : i32
    %c0_i32_1 = arith.constant 0 : i32
    return %arg0, %c0_i32, %c0_i32_0 : i32, i32, i32
  }
  func.func @transform_2(%arg0: i32) -> (i32, i32) {
    %c0_i32 = arith.constant 0 : i32
    %c0_i32_0 = arith.constant 0 : i32
    %c0_i32_1 = arith.constant 0 : i32
    return %c0_i32, %c0_i32_0 : i32, i32
  }
  func.func @transform_3(%arg0: i32) -> (i32, i32) {
    %c0_i32 = arith.constant 0 : i32
    %c0_i32_0 = arith.constant 0 : i32
    %c0_i32_1 = arith.constant 0 : i32
    return %c0_i32, %c0_i32_0 : i32, i32
  }
  func.func @transform_4(%arg0: i32) -> (i32, i32) {
    %c0_i32 = arith.constant 0 : i32
    %c0_i32_0 = arith.constant 0 : i32
    %c0_i32_1 = arith.constant 0 : i32
    return %c0_i32, %c0_i32_0 : i32, i32
  }
  func.func @transform_5(%arg0: i32) -> (i32, i32) {
    %c0_i32 = arith.constant 0 : i32
    %c0_i32_0 = arith.constant 0 : i32
    %c0_i32_1 = arith.constant 0 : i32
    return %c0_i32, %c0_i32_0 : i32, i32
  }
  func.func @transform_6(%arg0: i32) -> (i32, i32, i32) {
    %c0_i32 = arith.constant 0 : i32
    %c0_i32_0 = arith.constant 0 : i32
    %c0_i32_1 = arith.constant 0 : i32
    %c0_i32_2 = arith.constant 0 : i32
    return %c0_i32, %c0_i32_0, %c0_i32_1 : i32, i32, i32
  }
  func.func @transform_7(%arg0: i32) -> (i32, i32) {
    %c0_i32 = arith.constant 0 : i32
    %c0_i32_0 = arith.constant 0 : i32
    %c0_i32_1 = arith.constant 0 : i32
    return %c0_i32, %c0_i32_0 : i32, i32
  }
  func.func @transform_8(%arg0: i32) -> (i32, i32) {
    %c0_i32 = arith.constant 0 : i32
    %c0_i32_0 = arith.constant 0 : i32
    %c0_i32_1 = arith.constant 0 : i32
    return %c0_i32, %c0_i32_0 : i32, i32
  }
  func.func @transform_9(%arg0: i32) -> (i32, i32) {
    %c0_i32 = arith.constant 0 : i32
    %c0_i32_0 = arith.constant 0 : i32
    %c0_i32_1 = arith.constant 0 : i32
    return %c0_i32, %c0_i32_0 : i32, i32
  }
  func.func @transform_10(%arg0: i32) -> (i32, i32) {
    %c0_i32 = arith.constant 0 : i32
    %c0_i32_0 = arith.constant 0 : i32
    %c0_i32_1 = arith.constant 0 : i32
    return %c0_i32, %c0_i32_0 : i32, i32
  }
  func.func @transform_11(%arg0: i32) -> (i32, i32) {
    %c0_i32 = arith.constant 0 : i32
    %c0_i32_0 = arith.constant 0 : i32
    %c0_i32_1 = arith.constant 0 : i32
    return %c0_i32, %c0_i32_0 : i32, i32
  }
  func.func @transform_12(%arg0: i32) -> (i32, i32, i32) {
    %c0_i32 = arith.constant 0 : i32
    %c0_i32_0 = arith.constant 0 : i32
    %c0_i32_1 = arith.constant 0 : i32
    return %arg0, %c0_i32, %c0_i32_0 : i32, i32, i32
  }
}

</mosaic_0001>

<bundles_post_ra>
// kernel: tpu_custom_call.1
= control target key start
LH: loop header
LB: loop body
LE: loop exit
PB: predicated region body
PF: predicated region fallthrough
CT: control target
= control target key end

     0   :  { %s4097_s0 = inlined_call_operand.vmem [shape: f32[2,16,128], index: 0, kind: input, shape index: {}]   ;;  %s4098_s1 = inlined_call_operand.hbm [shape: f32[2,16,128], index: 1, kind: input, shape index: {}]   ;;  %s4099_s2 = inlined_call_operand.hbm [shape: f32[128,384], index: 2, kind: input, shape index: {}]   ;;  %s4100_s3 = inlined_call_operand.hbm [shape: f32[128,384], index: 3, kind: input, shape index: {}]   ;;  %s4101_s4 = inlined_call_operand.hbm [shape: f32[128,384], index: 4, kind: input, shape index: {}]   ;;  %s4102_s5 = inlined_call_operand.hbm [shape: f32[128,384], index: 5, kind: input, shape index: {}]   ;;  %s4103_s6 = inlined_call_operand.hbm [shape: f32[8,1,128], index: 6, kind: input, shape index: {}]   ;;  %s4104_s7 = inlined_call_operand.vmem [shape: f32[16,16], index: 7, kind: input, shape index: {}]   ;;  %s4105_s8 = inlined_call_operand.vmem [shape: f32[16,16], index: 8, kind: input, shape index: {}]   ;;  %s4106_s9 = inlined_call_operand.vmem [shape: f32[32,16], index: 9, kind: input, shape index: {}]   ;;  %s4107_s10 = inlined_call_operand.hbm [shape: f32[128,256], index: 10, kind: input, shape index: {}]   ;;  %s4108_s11 = inlined_call_operand.vmem [shape: f32[1,256], index: 11, kind: input, shape index: {}]   ;;  %s4109_s12 = inlined_call_operand.hbm [shape: f32[2,32,256], index: 12, kind: output, shape index: {}]  }
   0x1   :  { %4120 = sst [smem:[#allocation20_spill]] %s4099_s2 }
   0x2   :  { %4121 = sst [smem:[#allocation21_spill]] %s4101_s4 }
   0x3   :  { %4122 = sst [smem:[#allocation22_spill]] %s4105_s8 }
   0x4   :  { %4123 = sst [smem:[#allocation23_spill]] %s4106_s9 }
   0x5   :  { %4124 = sst [smem:[#allocation24_spill]] %s4108_s11 }
   0x6   :  { %4125 = sst [smem:[#allocation25_spill]] %s4109_s12 }
   0x7   :  { %17 = vsyncpa [#allocation3], 0 }
   0x8   :  { %19 = vsyncpa [#allocation3 + $0x1], 0 }
   0x9   :  { %20 = vsyncpa [#allocation6], 0 }
   0xa   :  { %21 = vsyncpa [#allocation9], 0 }
   0xb   :  { %22 = vsyncpa [#allocation12], 0 }
   0xc   :  { %23 = vsyncpa [#allocation4], 0 }
   0xd   :  { %25 = vsyncpa [#allocation4 + $0x1], 0  ;;  %s3636_s21 = smov 0   ;;  %s3638_s22 = smov 0  }
   0xe   :  { %s3640_s23 = smov 0   ;;  %s3642_s24 = smov 0  }
   0xf LB: > { %s3553_s25 = smov [#allocation5]   ;;  %s3657_s27 = sadd.s32 4294967295, %s3551_s24   ;;  %s3551_s24 = sphi %s3642_s24, %s4155_s24   ;;  %s3547_s23 = sphi %s3640_s23, %s4154_s23   ;;  %s3543_s22 = sphi %s3638_s22, %s4153_s22   ;;  %s3539_s21 = sphi %s3636_s21, %s4152_s21  }
  0x10   : > { %s336_s26 = sshll.u32 %s3553_s25, 4  ;;  %p2460_p0 = scmp.ge.s32.totalorder %s3551_s24, 1  ;;  %s3662_s26 = int_to_ptr.vmem [resolvable:$true] %s336_s26 }
  0x11   : > { %p4117_p1 = scmp.eq.s32.totalorder %s3657_s27, 0  ;;  %p324_p2 = scmp.lt.s32.totalorder %s3551_s24, 3 }
  0x12   : > { %s3554_s29 = smov [#allocation8]   ;;  %s3555_s14 = smov [#allocation11]  }
  0x13   : > { %p3664_p3 = pnand %p2460_p0, %p324_p2  ;;  %s362_s30 = sshll.u32 %s3554_s29, 4  ;;  %s3677_s30 = int_to_ptr.vmem [resolvable:$true] %s362_s30 }
  0x14   : > { %s388_s15 = sshll.u32 %s3555_s14, 4  ;;  %s4128_s2 = sld [smem:[#allocation20_spill]]  ;;  %s3679_s15 = int_to_ptr.vmem [resolvable:$true] %s388_s15 }
  0x15   : > { %s4126_s28 = scalar_select %p3664_p3, 1, 0 }
  0x16   : > { %p3186_p5 = pneg %p3664_p3 }
  0x18   : > { %p3673_p6 = pnand %p3186_p5, %p4117_p1 }
  0x1a   : > { %s3275_s18 = scalar_lea.hbm %s4128_s2, 6144  ;;  %p3689_p8 = pneg %p3673_p6 }
  0x1b   : > { %p3276_p7 = scmp.ne.s32.totalorder %s4128_s2, %s3275_s18  ;;  %p3282_p11 = scmp.lt.u32.totalorder %s3275_s18, %s4128_s2 }
  0x1d   : > { %p3278_p9 = pnand %p3689_p8, %p3276_p7 }
  0x1f   : > { %p3279_p10 = pneg %p3278_p9 }
  0x21   : > { %p3284_p12 = pnand %p3282_p11, %p3279_p10 }
  0x23   : > { %3287 = shalt.err (!%p3284_p12)
}
  0x24   : > { %s3288_s16 = scalar_lea.vmem %s3662_s26, 6144  ;;  %p3296_p5 = scmp.lt.s32.totalorder %s3662_s26, %s3662_s26 }
  0x25   : > { %p3289_p13 = scmp.ne.s32.totalorder %s3662_s26, %s3288_s16  ;;  %p3297_p4 = scmp.lt.s32.totalorder %s3288_s16, %s3288_s16 }
  0x27   : > { %p3291_p0 = pnand %p3289_p13, %p3689_p8  ;;  %p3298_p7 = por %p3297_p4, %p3296_p5 }
  0x29   : > { %p3292_p2 = pneg %p3291_p0 }
  0x2b   : > { %p3299_p9 = pnand %p3298_p7, %p3292_p2 }
  0x2d   : > { %3302 = shalt.err (!%p3299_p9)
}
  0x2e   : > { %s4113_s17 = smov 384   ;;  %s4115_s18 = smov 24  }
  0x2f   : > { %3189 = dma.hbm_to_vmem [thread:$0]  (!%p3673_p6), %s4128_s2, 6144, %s3662_s26, [#allocation6], %s4113_s17, %s4113_s17, %s4115_s18  }
  0x30   : > { %s4130_s4 = sld [smem:[#allocation21_spill]] }
  0x36   : > { %s3303_s16 = scalar_lea.hbm %s4130_s4, 6144 }
  0x37   : > { %p3304_p4 = scmp.ne.s32.totalorder %s4130_s4, %s3303_s16  ;;  %p3310_p12 = scmp.lt.u32.totalorder %s3303_s16, %s4130_s4 }
  0x39   : > { %p3306_p10 = pnand %p3304_p4, %p3689_p8 }
  0x3b   : > { %p3307_p11 = pneg %p3306_p10 }
  0x3d   : > { %p3312_p13 = pnand %p3310_p12, %p3307_p11 }
  0x3f   : > { %3315 = shalt.err (!%p3312_p13)
}
  0x40   : > { %s3316_s26 = scalar_lea.vmem %s3677_s30, 6144  ;;  %p3324_p7 = scmp.lt.s32.totalorder %s3677_s30, %s3677_s30 }
  0x41   : > { %p3317_p0 = scmp.ne.s32.totalorder %s3677_s30, %s3316_s26  ;;  %p3325_p9 = scmp.lt.s32.totalorder %s3316_s26, %s3316_s26 }
  0x43   : > { %p3319_p2 = pnand %p3317_p0, %p3689_p8  ;;  %p3326_p4 = por %p3325_p9, %p3324_p7 }
  0x45   : > { %p3320_p5 = pneg %p3319_p2 }
  0x47   : > { %p3327_p10 = pnand %p3326_p4, %p3320_p5 }
  0x49   : > { %3330 = shalt.err (!%p3327_p10)
}
  0x4a   : > { %3195 = dma.hbm_to_vmem [thread:$0]  (!%p3673_p6), %s4130_s4, 6144, %s3677_s30, [#allocation9], %s4113_s17, %s4113_s17, %s4115_s18  }
  0x4b   : > { %s3331_s19 = scalar_lea.hbm %s4103_s6, 128 }
  0x4c   : > { %p3332_p11 = scmp.ne.s32.totalorder %s4103_s6, %s3331_s19  ;;  %p3338_p0 = scmp.lt.u32.totalorder %s3331_s19, %s4103_s6 }
  0x4e   : > { %p3334_p12 = pnand %p3332_p11, %p3689_p8 }
  0x50   : > { %p3335_p13 = pneg %p3334_p12 }
  0x52   : > { %p3340_p2 = pnand %p3338_p0, %p3335_p13 }
  0x54   : > { %3343 = shalt.err (!%p3340_p2)
}
  0x55   : > { %s3344_s30 = scalar_lea.vmem %s3679_s15, 128  ;;  %p3352_p4 = scmp.lt.s32.totalorder %s3679_s15, %s3679_s15 }
  0x56   : > { %p3345_p5 = scmp.ne.s32.totalorder %s3679_s15, %s3344_s30  ;;  %p3353_p10 = scmp.lt.s32.totalorder %s3344_s30, %s3344_s30 }
  0x58   : > { %p3347_p7 = pnand %p3345_p5, %p3689_p8  ;;  %p3354_p11 = por %p3353_p10, %p3352_p4 }
  0x5a   : > { %p3348_p9 = pneg %p3347_p7 }
  0x5c   : > { %p3355_p12 = pnand %p3354_p11, %p3348_p9 }
  0x5e   : > { %3358 = shalt.err (!%p3355_p12)
}
  0x5f   : > { %s3558_s26 = smov 16   ;;  %s3559_s8 = smov 1  }
  0x60   : > { %3201 = dma.hbm_to_vmem [thread:$0]  (!%p3673_p6), %s4103_s6, 128, %s3679_s15, [#allocation12], %s3558_s26, %s3558_s26, %s3559_s8  }
  0x61   : > { %s3560_s12 = smov [#allocation7]   ;;  %s3561_s20 = smov [#allocation10]  }
  0x62   : > { %s349_s19 = sshll.u32 %s3560_s12, 4  ;;  %s375_s29 = sshll.u32 %s3561_s20, 4  ;;  %s350_s19 = int_to_ptr.vmem [resolvable:$true] %s349_s19  ;;  %s376_s29 = int_to_ptr.vmem [resolvable:$true] %s375_s29 }
  0x63   : > { %s3359_s30 = scalar_lea.hbm %s4100_s3, 6144 }
  0x64   : > { %p3360_p13 = scmp.ne.s32.totalorder %s4100_s3, %s3359_s30  ;;  %p3366_p5 = scmp.lt.u32.totalorder %s3359_s30, %s4100_s3 }
  0x66   : > { %p3362_p0 = pnand %p3360_p13, %p3689_p8 }
  0x68   : > { %p3363_p2 = pneg %p3362_p0 }
  0x6a   : > { %p3368_p7 = pnand %p3366_p5, %p3363_p2 }
  0x6c   : > { %3371 = shalt.err (!%p3368_p7)
}
  0x6d   : > { %s3372_s15 = scalar_lea.vmem %s350_s19, 6144  ;;  %p3380_p11 = scmp.lt.s32.totalorder %s350_s19, %s350_s19 }
  0x6e   : > { %p3373_p9 = scmp.ne.s32.totalorder %s350_s19, %s3372_s15  ;;  %p3381_p12 = scmp.lt.s32.totalorder %s3372_s15, %s3372_s15 }
  0x70   : > { %p3375_p4 = pnand %p3373_p9, %p3689_p8  ;;  %p3382_p1 = por %p3381_p12, %p3380_p11 }
  0x72   : > { %p3376_p10 = pneg %p3375_p4 }
  0x74   : > { %p3383_p3 = pnand %p3382_p1, %p3376_p10 }
  0x76   : > { %3386 = shalt.err (!%p3383_p3)
}
  0x77   : > { %s4131_s17 = smov 24   ;;  %s4132_s18 = smov 384  }
  0x78   : > { %3192 = dma.hbm_to_vmem [thread:$0]  (!%p3673_p6), %s4100_s3, 6144, %s350_s19, [#allocation6], %s4132_s18, %s4132_s18, %s4131_s17  }
  0x79   : > { %s3387_s11 = scalar_lea.hbm %s4102_s5, 6144 }
  0x7a   : > { %p3388_p1 = scmp.ne.s32.totalorder %s4102_s5, %s3387_s11  ;;  %p3394_p0 = scmp.lt.u32.totalorder %s3387_s11, %s4102_s5 }
  0x7c   : > { %p3390_p3 = pnand %p3388_p1, %p3689_p8 }
  0x7e   : > { %p3391_p13 = pneg %p3390_p3 }
  0x80   : > { %p3396_p2 = pnand %p3394_p0, %p3391_p13 }
  0x82   : > { %3399 = shalt.err (!%p3396_p2)
}
  0x83   : > { %s3400_s30 = scalar_lea.vmem %s376_s29, 6144  ;;  %p3408_p4 = scmp.lt.s32.totalorder %s376_s29, %s376_s29 }
  0x84   : > { %p3401_p5 = scmp.ne.s32.totalorder %s376_s29, %s3400_s30  ;;  %p3409_p10 = scmp.lt.s32.totalorder %s3400_s30, %s3400_s30 }
  0x86   : > { %p3403_p7 = pnand %p3401_p5, %p3689_p8  ;;  %p3410_p11 = por %p3409_p10, %p3408_p4 }
  0x88   : > { %p3404_p9 = pneg %p3403_p7 }
  0x8a   : > { %p3411_p12 = pnand %p3410_p11, %p3404_p9 }
  0x8c   : > { %3414 = shalt.err (!%p3411_p12)
}
  0x8d   : > { %3198 = dma.hbm_to_vmem [thread:$0]  (!%p3673_p6), %s4102_s5, 6144, %s376_s29, [#allocation9], %s4132_s18, %s4132_s18, %s4131_s17  }
  0x8e   : > { %s3562_s2 = smov [#allocation13]   ;;  %s3415_s11 = scalar_lea.hbm %s4107_s10, 4096 }
  0x8f   : > { %s410_s4 = sshll.u32 %s3562_s2, 4  ;;  %p3416_p1 = scmp.ne.s32.totalorder %s4107_s10, %s3415_s11  ;;  %s411_s4 = int_to_ptr.vmem [resolvable:$true] %s410_s4 }
  0x90   : > { %p3422_p0 = scmp.lt.u32.totalorder %s3415_s11, %s4107_s10 }
  0x91   : > { %p3418_p3 = pnand %p3416_p1, %p3689_p8 }
  0x93   : > { %p3419_p13 = pneg %p3418_p3 }
  0x95   : > { %p3424_p2 = pnand %p3422_p0, %p3419_p13 }
  0x97   : > { %3427 = shalt.err (!%p3424_p2)
}
  0x98   : > { %s3428_s29 = scalar_lea.vmem %s411_s4, 4096  ;;  %p3436_p4 = scmp.lt.s32.totalorder %s411_s4, %s411_s4 }
  0x99   : > { %p3429_p5 = scmp.ne.s32.totalorder %s411_s4, %s3428_s29  ;;  %p3437_p10 = scmp.lt.s32.totalorder %s3428_s29, %s3428_s29 }
  0x9b   : > { %p3431_p7 = pnand %p3429_p5, %p3689_p8  ;;  %p3438_p11 = por %p3437_p10, %p3436_p4 }
  0x9d   : > { %p3432_p9 = pneg %p3431_p7 }
  0x9f   : > { %p3439_p12 = pnand %p3438_p11, %p3432_p9 }
  0xa1   : > { %3442 = shalt.err (!%p3439_p12)
}
  0xa2   : > { %s3563_s17 = smov 256   ;;  %s2459_s13 = sadd.s32 4294967294, %s3551_s24  }
  0xa3   : > { %3204 = dma.hbm_to_vmem [thread:$0]  (!%p3673_p6), %s4107_s10, 4096, %s411_s4, [#allocation12], %s3563_s17, %s3563_s17, %s3558_s26  }
  0xa4   : > { %s3827_s25 = sadd.s32 1, %s3551_s24   ;;  %s64_s19 = sadd.s32 1, %s3547_s23 }
  0xa5   : > { %s61_s15 = ssub.s32 %s3551_s24, %s3827_s25  ;;  %p71_p8 = scmp.ne.s32.totalorder %s3547_s23, %s3543_s22 }
  0xa6   : > { %p62_p1 = scmp.eq.s32.totalorder %s61_s15, 0  ;;  %p72_p3 = scmp.eq.s32.totalorder %s3551_s24, 0 }
  0xa7   : > { %p77_p13 = scmp.ne.s32.totalorder %s3543_s22, %s3539_s21  ;;  %p311_p0 = scmp.eq.s32.totalorder %s3657_s27, 1 }
  0xa8   : > { %s3839_s2 = scalar_select %p62_p1, %s3547_s23, %s64_s19  }
  0xa9   : > { %p73_p2 = por %p72_p3, %p71_p8  ;;  %p4133_p5 = scmp.eq.s32.totalorder %s3657_s27, 0 }
  0xaa   : > { %p3847_p6 = por %p311_p0, %p71_p8  ;;  %p317_p9 = scmp.eq.s32.totalorder %s2459_s13, 1 }
  0xab   : > { %p3843_p7 = por %p4133_p5, %p77_p13  ;;  %p3219_p4 = scmp.lt.s32.totalorder %s3551_s24, 2 }
  0xac   : > { %s4135_s26 = scalar_select %p3847_p6, 1, 0 }
  0xad   : > { %s435_s4 = sand.u32 1, %s3547_s23   ;;  %p3853_p10 = por %p317_p9, %p77_p13 }
  0xae   : > { %s2468_s11 = sshll.u32 %s435_s4, 4  ;;  %s2515_s12 = sshll.u32 %s3551_s24, 8 }
  0xaf   : > { %s4136_s9 = scalar_select %p3853_p10, 1, 0 }
  0xb0   : > { %s3861_s16 = scalar_lea.hbm %s4098_s1, %s2515_s12  ;;  %s439_s29 = scalar_lea.vmem [#allocation2], %s2468_s11 }
  0xb1   : > { %s446_s17 = sshll.u32 %s439_s29, 4  ;;  %p3863_p11 = pnand %p3219_p4, %p73_p2  ;;  %s3867_s17 = int_to_ptr.vmem [resolvable:$true] %s446_s17 }
  0xb2   : > { %s3869_s30 = scalar_lea.sflag [#allocation3], %s435_s4  ;;  %s3443_s13 = scalar_lea.hbm %s3861_s16, 256 }
  0xb3   : > { %p3444_p12 = scmp.ne.s32.totalorder %s3861_s16, %s3443_s13  ;;  %p3445_p8 = pneg %p3863_p11 }
  0xb4   : > { %s3448_s11 = scalar_lea.hbm %s4098_s1, 512  ;;  %p3449_p13 = scmp.lt.u32.totalorder %s3861_s16, %s4098_s1 }
  0xb5   : > { %p3446_p1 = pnand %p3445_p8, %p3444_p12  ;;  %p3450_p0 = scmp.lt.u32.totalorder %s3448_s11, %s3443_s13 }
  0xb6   : > { %p3452_p5 = scmp.lt.u32.totalorder %s3443_s13, %s3861_s16 }
  0xb7   : > { %p3447_p3 = pneg %p3446_p1  ;;  %p3451_p2 = por %p3450_p0, %p3449_p13 }
  0xb9   : > { %p3453_p9 = por %p3452_p5, %p3451_p2 }
  0xbb   : > { %p3454_p4 = pnand %p3453_p9, %p3447_p3 }
  0xbd   : > { %3457 = shalt.err (!%p3454_p4)
}
  0xbe   : > { %s3458_s4 = scalar_lea.vmem %s3867_s17, 256  ;;  %s3564_s14 = smov [#allocation2]  }
  0xbf   : > { %p3459_p12 = scmp.ne.s32.totalorder %s3867_s17, %s3458_s4  ;;  %s3463_s29 = sshll.u32 %s3564_s14, 4  ;;  %s3464_s29 = int_to_ptr.vmem [resolvable:$false] %s3463_s29 }
  0xc0   : > { %s3465_s19 = scalar_lea.vmem %s3464_s29, 512  ;;  %p3466_p6 = scmp.lt.s32.totalorder %s3867_s17, %s3464_s29 }
  0xc1   : > { %p3461_p1 = pnand %p3459_p12, %p3445_p8  ;;  %p3467_p13 = scmp.lt.s32.totalorder %s3465_s19, %s3458_s4 }
  0xc3   : > { %p3462_p10 = pneg %p3461_p1  ;;  %p3468_p0 = por %p3467_p13, %p3466_p6 }
  0xc5   : > { %p3469_p2 = pnand %p3468_p0, %p3462_p10 }
  0xc7   : > { %3472 = shalt.err (!%p3469_p2)
}
  0xc8   : > { %s3565_s13 = smov 128   ;;  %s3566_s15 = smov 8  }
  0xc9   : > { %3208 = dma.hbm_to_vmem [thread:$0]  (!%p3863_p11), %s3861_s16, 256, %s3867_s17, %s3869_s30, %s3565_s13, %s3565_s13, %s3566_s15  }
  0xca   : > { %p4138_p8 = scmp.ne.s32.totalorder %s4126_s28, 0 }
  0xcb   : > { %s3900_s11 = sand.u32 (!%p4138_p8), 1, %s3543_s22  }
  0xcc   : > { %458 = sbr.rel (%p4138_p8) target bundleno = 2531 (0x9e3), region = 68  ;;  %s2472_s12 = sshll.u32 (!%p4138_p8), %s3900_s11, 4 }
  0xcd   : > { %s461_s20 = scalar_lea.sflag (!%p4138_p8), [#allocation3], %s3900_s11  ;;  %s3904_s4 = scalar_lea.vmem (!%p4138_p8), [#allocation2], %s2472_s12 }
  0xd3   : > { %3518 = dma.done.wait (%p3843_p7), %s461_s20, 256  }
  0xd4   : > { %3520 = vsyncadd (%p3843_p7), %s461_s20, 4294967040  ;;  %p4139_p6 = scmp.eq.s32.totalorder %s3657_s27, 0 }
  0xd6   : > { %3522 = dma.done.wait (%p4139_p6), [#allocation6], 12288   ;;  %p4140_p10 = pmov %p4139_p6 }
  0xd7   : > { %p4141_p11 = pmov %p4139_p6 }
  0xd8   : > { %3524 = vsyncadd (%p4140_p10), [#allocation6], 4294955008 }
  0xd9   : > { %3526 = dma.done.wait (%p4141_p11), [#allocation9], 12288   ;;  %p4142_p3 = pmov %p4139_p6 }
  0xdb   : > { %3528 = vsyncadd (%p4142_p3), [#allocation9], 4294955008  ;;  %p4143_p5 = pmov %p4142_p3 }
  0xdc   : > { %p4144_p9 = pmov %p4142_p3 }
  0xdd   : > { %3530 = dma.done.wait (%p4143_p5), [#allocation12], 4224  }
  0xde   : > { %3532 = vsyncadd (%p4144_p9), [#allocation12], 4294963072  ;;  %v3567_v0 = vmov 0.0   ;;  %v557_v1 = vld [vmem:[#allocation5 + $0x8] sm:$0xff]  ;;  %v560_v2 = vld [vmem:[#allocation5 + $0x20] sm:$0xff]  ;;  %p534_p7 = scmp.lt.s32.totalorder %s3657_s27, 1 }
  0xdf   : > { %668 = vmatprep.mubr.f32.mxu0 %v3567_v0  ;;  %v556_v3 = vld [vmem:[#allocation5] sm:$0xff]  ;;  %v2834_v4 = vpack.c.bf16 %v560_v2, %v557_v1  ;;  %v559_v5 = vld [vmem:[#allocation5 + $0x18] sm:$0xff]  ;;  %v566_v7 = vld [vmem:[#allocation5 + $0x50] sm:$0xff]  ;;  %vm756_vm0 = vcmask 130048   ;;  %s4145_s13 = sld [smem:[#allocation22_spill]]  ;;  %s4146_s16 = sld [smem:[#allocation23_spill]] }
  0xe0   : > { %v563_v6 = vld [vmem:[#allocation5 + $0x38] sm:$0xff]  ;;  %v2836_v8 = vpack.c.bf16 %v559_v5, %v556_v3  ;;  %v562_v10 = vld [vmem:[#allocation5 + $0x30] sm:$0xff]  ;;  %v565_v11 = vld [vmem:[#allocation5 + $0x48] sm:$0xff]  ;;  %s535_s28 = scalar_select %p534_p7, %s3657_s27, 1 }
  0xe1   : > { %v2838_v9 = vpack.c.bf16 %v566_v7, %v563_v6  ;;  %v569_v12 = vld [vmem:[#allocation5 + $0x68] sm:$0xff]  ;;  %2835 = vmatprep.subr.bf16.mxu0 %v2834_v4  ;;  %v572_v13 = vld [vmem:[#allocation5 + $0x80] sm:$0xff]  ;;  %v2840_v14 = vpack.c.bf16 %v565_v11, %v562_v10  ;;  %v571_v17 = vld [vmem:[#allocation5 + $0x78] sm:$0xff]  ;;  %s4147_s20 = sld [smem:[#allocation24_spill]]  ;;  %s2517_s17 = sshll.u32 %s3657_s27, 10 }
  0xe2   : > { %2837 = vmatpush1.bf16.msra.mxu0 %v2836_v8  ;;  %v2842_v15 = vpack.c.bf16 %v572_v13, %v569_v12  ;;  %v568_v16 = vld [vmem:[#allocation5 + $0x60] sm:$0xff]  ;;  %v575_v18 = vld [vmem:[#allocation5 + $0x98] sm:$0xff]  ;;  %v578_v19 = vld [vmem:[#allocation5 + $0xb0] sm:$0xff]  ;;  %s2516_s8 = sshll.u32 %s535_s28, 4  ;;  %s2479_s28 = sshll.u32 %s3900_s11, 6 }
  0xe3   : > { %2839 = vmatprep.subr.bf16.mxu0 %v2838_v9  ;;  %v2844_v20 = vpack.c.bf16 %v571_v17, %v568_v16  ;;  %v2846_v21 = vpack.c.bf16 %v578_v19, %v575_v18  ;;  %v574_v22 = vld [vmem:[#allocation5 + $0x90] sm:$0xff]  ;;  %v577_v23 = vld [vmem:[#allocation5 + $0xa8] sm:$0xff]  ;;  %v584_v25 = vld [vmem:[#allocation5 + $0xe0] sm:$0xff]  ;;  %s538_s18 = scalar_lea.vmem %s4097_s0, %s2516_s8  ;;  %s4148_s14 = sld [smem:[#allocation25_spill]] }
  0xe4   : > { %v581_v24 = vld [vmem:[#allocation5 + $0xc8] sm:$0xff]  ;;  %v2848_v26 = vpack.c.bf16 %v577_v23, %v574_v22  ;;  %v580_v28 = vld [vmem:[#allocation5 + $0xc0] sm:$0xff]  ;;  %v583_v29 = vld [vmem:[#allocation5 + $0xd8] sm:$0xff]  ;;  %s2304_s19 = scalar_lea.sflag [#allocation4], %s3900_s11  ;;  %p4149_p12 = scmp.ne.s32.totalorder %s4135_s26, 0 }
  0xe5   : > { %v2850_v27 = vpack.c.bf16 %v584_v25, %v581_v24  ;;  %v587_v30 = vld [vmem:[#allocation5 + $0xf8] sm:$0xff]  ;;  %v590_v31 = vld [vmem:[#allocation5 + $0x110] sm:$0xff]  ;;  %v2852_v32 = vpack.c.bf16 %v583_v29, %v580_v28  ;;  %v589_v35 = vld [vmem:[#allocation5 + $0x108] sm:$0xff]  ;;  %s3568_s15 = smov [#allocation14]  }
  0xe6   : > { %2841 = vmatpush1.bf16.msra.mxu0 %v2840_v14  ;;  %v2854_v33 = vpack.c.bf16 %v590_v31, %v587_v30  ;;  %v586_v34 = vld [vmem:[#allocation5 + $0xf0] sm:$0xff]  ;;  %v593_v36 = vld [vmem:[#allocation5 + $0x128] sm:$0xff]  ;;  %v596_v37 = vld [vmem:[#allocation5 + $0x140] sm:$0xff]  ;;  %s3477_s12 = sshll.u32 %s3568_s15, 4  ;;  %s3478_s12 = int_to_ptr.vmem [resolvable:$false] %s3477_s12 }
  0xe7   : > { %2843 = vmatprep.subr.bf16.mxu0 %v2842_v15  ;;  %v2856_v38 = vpack.c.bf16 %v589_v35, %v586_v34  ;;  %v2858_v39 = vpack.c.bf16 %v596_v37, %v593_v36  ;;  %v592_v40 = vld [vmem:[#allocation5 + $0x120] sm:$0xff]  ;;  %v595_v41 = vld [vmem:[#allocation5 + $0x138] sm:$0xff]  ;;  %v602_v43 = vld [vmem:[#allocation5 + $0x170] sm:$0xff] }
  0xe8   : > { %v599_v42 = vld [vmem:[#allocation5 + $0x158] sm:$0xff]  ;;  %v2860_v44 = vpack.c.bf16 %v595_v41, %v592_v40  ;;  %v598_v46 = vld [vmem:[#allocation5 + $0x150] sm:$0xff]  ;;  %v601_v47 = vld [vmem:[#allocation5 + $0x168] sm:$0xff] }
  0xe9   : > { %v2862_v45 = vpack.c.bf16 %v602_v43, %v599_v42  ;;  %v558_v48 = vld [vmem:[#allocation5 + $0x10] sm:$0xff]  ;;  %v561_v49 = vld [vmem:[#allocation5 + $0x28] sm:$0xff]  ;;  %v2864_v50 = vpack.c.bf16 %v601_v47, %v598_v46  ;;  %v3928_v51 = vld [vmem:[%s538_s18] sm:$0xff]  ;;  %s4053_s29 = scalar_lea.hbm %s4148_s14, %s2517_s17 }
  0xea   : > { %2845 = vmatpush1.bf16.msra.mxu0 %v2844_v20  ;;  %v2866_v52 = vpack.c.bf16 %v561_v49, %v558_v48  ;;  %v564_v53 = vld [vmem:[#allocation5 + $0x40] sm:$0xff]  ;;  %v567_v54 = vld [vmem:[#allocation5 + $0x58] sm:$0xff]  ;;  %v554_v55 = vmax.f32 %v3928_v51, 0.0  ;;  %v3931_v56 = vld [vmem:[%s538_s18 + $0x8] sm:$0xff] }
  0xeb   : > { %2847 = vmatprep.subr.bf16.mxu0 %v2846_v21  ;;  %v2870_v57 = vpack.c.bf16 %v567_v54, %v564_v53  ;;  %v570_v58 = vld [vmem:[#allocation5 + $0x70] sm:$0xff]  ;;  %v573_v59 = vld [vmem:[#allocation5 + $0x88] sm:$0xff]  ;;  %v555_v60 = vmax.f32 %v3931_v56, 0.0  ;;  %v576_v62 = vld [vmem:[#allocation5 + $0xa0] sm:$0xff] }
  0xec   : > { %v2874_v61 = vpack.c.bf16 %v573_v59, %v570_v58  ;;  %v579_v63 = vld [vmem:[#allocation5 + $0xb8] sm:$0xff]  ;;  %v582_v2 = vld [vmem:[#allocation5 + $0xd0] sm:$0xff]  ;;  %v585_v3 = vld [vmem:[#allocation5 + $0xe8] sm:$0xff] }
  0xed   : > { %v2878_v1 = vpack.c.bf16 %v579_v63, %v576_v62  ;;  %v2882_v4 = vpack.c.bf16 %v585_v3, %v582_v2  ;;  %v588_v5 = vld [vmem:[#allocation5 + $0x100] sm:$0xff]  ;;  %v591_v6 = vld [vmem:[#allocation5 + $0x118] sm:$0xff]  ;;  %v594_v8 = vld [vmem:[#allocation5 + $0x130] sm:$0xff] }
  0xee   : > { %2849 = vmatpush1.bf16.msra.mxu0 %v2848_v26  ;;  %v2886_v7 = vpack.c.bf16 %v591_v6, %v588_v5  ;;  %v597_v9 = vld [vmem:[#allocation5 + $0x148] sm:$0xff]  ;;  %v600_v11 = vld [vmem:[#allocation5 + $0x160] sm:$0xff]  ;;  %v603_v12 = vld [vmem:[#allocation5 + $0x178] sm:$0xff] }
  0xef   : > { %2851 = vmatprep.subr.bf16.mxu0 %v2850_v27  ;;  %v2890_v10 = vpack.c.bf16 %v597_v9, %v594_v8  ;;  %v2894_v13 = vpack.c.bf16 %v603_v12, %v600_v11  ;;  %v3938_v14 = vld [vmem:[%s4104_s7] sm:$0xff]  ;;  %v3956_v21 = vld [vmem:[%s4104_s7 + $0x8] sm:$0xff]  ;;  %v942_v30 = vld [vmem:[#allocation7 + $0x18] sm:$0xff] }
  0xf0   : > { %2667 = vmatprep.mubr.msk.f32.mxu1 %vm756_vm0, %v3938_v14  ;;  %v3945_v15 = vld [vmem:[%s4145_s13] sm:$0xff]  ;;  %v3964_v25 = vld [vmem:[%s4145_s13 + $0x8] sm:$0xff]  ;;  %v941_v31 = vld [vmem:[#allocation7 + $0x10] sm:$0xff] }
  0xf1   : > { %v940_v26 = vld [vmem:[#allocation7 + $0x8] sm:$0xff]  ;;  %v943_v27 = vld [vmem:[#allocation7 + $0x20] sm:$0xff]  ;;  %v946_v35 = vld [vmem:[#allocation7 + $0x38] sm:$0xff] }
  0xf2   : > { %2853 = vmatpush1.bf16.msra.mxu0 %v2852_v32  ;;  %v939_v28 = vld [vmem:[#allocation7] sm:$0xff]  ;;  %v2906_v29 = vpack.c.bf16 %v943_v27, %v940_v26  ;;  %v944_v32 = vld [vmem:[#allocation7 + $0x28] sm:$0xff]  ;;  %v949_v36 = vld [vmem:[#allocation7 + $0x50] sm:$0xff] }
  0xf3   : > { %2855 = vmatprep.subr.bf16.mxu0 %v2854_v33  ;;  %v2908_v33 = vpack.c.bf16 %v942_v30, %v939_v28  ;;  %v2938_v34 = vpack.c.bf16 %v944_v32, %v941_v31  ;;  %v945_v37 = vld [vmem:[#allocation7 + $0x30] sm:$0xff]  ;;  %v947_v40 = vld [vmem:[#allocation7 + $0x40] sm:$0xff]  ;;  %v950_v41 = vld [vmem:[#allocation7 + $0x58] sm:$0xff] }
  0xf4   : > { %v2942_v43 = vpack.c.bf16 %v950_v41, %v947_v40  ;;  %v951_v46 = vld [vmem:[#allocation7 + $0x60] sm:$0xff]  ;;  %v954_v48 = vld [vmem:[#allocation7 + $0x78] sm:$0xff]  ;;  %v953_v49 = vld [vmem:[#allocation7 + $0x70] sm:$0xff] }
  0xf5   : > { %v958_v53 = vld [vmem:[#allocation7 + $0x98] sm:$0xff]  ;;  %v961_v54 = vld [vmem:[#allocation7 + $0xb0] sm:$0xff]  ;;  %v2916_v58 = vpack.c.bf16 %v954_v48, %v951_v46  ;;  %v964_v63 = vld [vmem:[#allocation7 + $0xc8] sm:$0xff] }
  0xf6   : > { %2857 = vmatpush1.bf16.msra.mxu0 %v2856_v38  ;;  %v2910_v38 = vpack.c.bf16 %v949_v36, %v946_v35  ;;  %v2918_v59 = vpack.c.bf16 %v961_v54, %v958_v53  ;;  %v965_v2 = vld [vmem:[#allocation7 + $0xd0] sm:$0xff]  ;;  %v968_v3 = vld [vmem:[#allocation7 + $0xe8] sm:$0xff]  ;;  %v963_v6 = vld [vmem:[#allocation7 + $0xc0] sm:$0xff] }
  0xf7   : > { %2859 = vmatprep.subr.bf16.mxu0 %v2858_v39  ;;  %v948_v39 = vld [vmem:[#allocation7 + $0x48] sm:$0xff]  ;;  %v2954_v8 = vpack.c.bf16 %v968_v3, %v965_v2  ;;  %v970_v9 = vld [vmem:[#allocation7 + $0xf8] sm:$0xff]  ;;  %v971_v11 = vld [vmem:[#allocation7 + $0x100] sm:$0xff] }
  0xf8   : > { %v2912_v42 = vpack.c.bf16 %v948_v39, %v945_v37  ;;  %v974_v12 = vld [vmem:[#allocation7 + $0x118] sm:$0xff]  ;;  %v979_v26 = vld [vmem:[#allocation7 + $0x140] sm:$0xff]  ;;  %v977_v30 = vld [vmem:[#allocation7 + $0x130] sm:$0xff] }
  0xf9   : > { %v975_v28 = vld [vmem:[#allocation7 + $0x120] sm:$0xff]  ;;  %v980_v32 = vld [vmem:[#allocation7 + $0x148] sm:$0xff]  ;;  %v985_v35 = vld [vmem:[#allocation7 + $0x170] sm:$0xff] }
  0xfa   : > { %2861 = vmatpush1.bf16.msra.mxu0 %v2860_v44  ;;  %v952_v44 = vld [vmem:[#allocation7 + $0x68] sm:$0xff]  ;;  %v981_v37 = vld [vmem:[#allocation7 + $0x150] sm:$0xff]  ;;  %v983_v39 = vld [vmem:[#allocation7 + $0x160] sm:$0xff] }
  0xfb   : > { %2863 = vmatprep.subr.bf16.mxu0 %v2862_v45  ;;  %v955_v45 = vld [vmem:[#allocation7 + $0x80] sm:$0xff]  ;;  %v986_v41 = vld [vmem:[#allocation7 + $0x178] sm:$0xff]  ;;  %v1322_v2 = vld [vmem:[#allocation8 + $0x8] sm:$0xff] }
  0xfc   : > { %v2914_v47 = vpack.c.bf16 %v955_v45, %v952_v44  ;;  %v1325_v3 = vld [vmem:[#allocation8 + $0x20] sm:$0xff] }
  0xfe   : > { %2865 = vmatpush1.bf16.msra.mxu0 %v2864_v50  ;;  %v956_v50 = vld [vmem:[#allocation7 + $0x88] sm:$0xff] }
  0xff   : > { %2867 = vmatprep.subr.bf16.mxu0 %v2866_v52 }
 0x101   : > { %669 = vmatmul.mubr.f32.vlgmr.msra.gmra.mrb[0].mxu0 %v554_v55 }
 0x102   : > { %2869 = vmatpush3.bf16.msra.mxu0 %v2866_v52  ;;  %674 = vmatprep.mubr.f32.mxu0 %v3567_v0  ;;  %v2946_v52 = vpack.c.bf16 %v956_v50, %v953_v49 }
 0x103   : > { %2871 = vmatprep.subr.bf16.mxu0 %v2870_v57 }
 0x105   : > { %675 = vmatmul.mubr.f32.gmra.mrb[2].mxu0 %v555_v60 }
 0x106   : > { %2873 = vmatpush3.bf16.msra.mxu0 %v2870_v57  ;;  %2660 = vmatprep.mubr.f32.mxu0 %v554_v55  ;;  %v959_v55 = vld [vmem:[#allocation7 + $0xa0] sm:$0xff]  ;;  %v962_v57 = vld [vmem:[#allocation7 + $0xb8] sm:$0xff] }
 0x107   : > { %2875 = vmatprep.subr.bf16.mxu0 %v2874_v61  ;;  %v2950_v62 = vpack.c.bf16 %v962_v57, %v959_v55 }
 0x10a   : > { %2877 = vmatpush3.bf16.msra.mxu0 %v2874_v61  ;;  %v960_v61 = vld [vmem:[#allocation7 + $0xa8] sm:$0xff] }
 0x10b   : > { %2879 = vmatprep.subr.bf16.mxu0 %v2878_v1 }
 0x10e   : > { %2881 = vmatpush3.bf16.msra.mxu0 %v2878_v1  ;;  %v967_v1 = vld [vmem:[#allocation7 + $0xe0] sm:$0xff] }
 0x10f   : > { %2883 = vmatprep.subr.bf16.mxu0 %v2882_v4  ;;  %v2922_v5 = vpack.c.bf16 %v967_v1, %v964_v63 }
 0x112   : > { %2885 = vmatpush3.bf16.msra.mxu0 %v2882_v4 }
 0x113   : > { %2887 = vmatprep.subr.bf16.mxu0 %v2886_v7 }
 0x116   : > { %2889 = vmatpush3.bf16.msra.mxu0 %v2886_v7  ;;  %v966_v7 = vld [vmem:[#allocation7 + $0xd8] sm:$0xff] }
 0x117   : > { %2891 = vmatprep.subr.bf16.mxu0 %v2890_v10 }
 0x11a   : > { %2893 = vmatpush3.bf16.msra.mxu0 %v2890_v10  ;;  %v973_v10 = vld [vmem:[#allocation7 + $0x110] sm:$0xff] }
 0x11b   : > { %2895 = vmatprep.subr.bf16.mxu0 %v2894_v13 }
 0x11e   : > { %2897 = vmatpush3.bf16.msra.mxu0 %v2894_v13  ;;  %v2924_v13 = vpack.c.bf16 %v966_v7, %v963_v6  ;;  %v1329_v7 = vld [vmem:[#allocation8 + $0x40] sm:$0xff] }
 0x121   : > { %2661 = vmatmul.mubr.f32.vlgmr.msra.gmra.mrb[4].mxu0 %v555_v60  ;;  %v957_v60 = vld [vmem:[#allocation7 + $0x90] sm:$0xff] }
 0x122   : > { %2674 = vmatprep.mubr.msk.f32.mxu0 %vm756_vm0, %v3945_v15  ;;  %v2920_v4 = vpack.c.bf16 %v960_v61, %v957_v60  ;;  %v1326_v61 = vld [vmem:[#allocation8 + $0x28] sm:$0xff] }
 0x1d4   : > { %v670_v16 = vpop.f32.mrb[0].mxu0 }
 0x1d5   : > { %v3949_v17 = vpop.f32.mrb[1].mxu0 }
 0x1d8   : > { %v676_v18 = vpop.f32.mrb[2].mxu0 }
 0x1d9   : > { %v2898_v19 = vpack.c.bf16 %v676_v18, %v670_v16  ;;  %v3951_v20 = vpop.f32.mrb[3].mxu0  ;;  %v2926_v16 = vpack.c.bf16 %v973_v10, %v970_v9  ;;  %v969_v18 = vld [vmem:[#allocation7 + $0xf0] sm:$0xff] }
 0x1db   : > { %2899 = vmatprep.subr.bf16.mxu1 %v2898_v19 }
 0x1dc   : > { %2901 = vmatpush3.bf16.msra.mxu1 %v2898_v19  ;;  %v972_v19 = vld [vmem:[#allocation7 + $0x108] sm:$0xff] }
 0x1dd   : > { %2907 = vmatprep.subr.bf16.mxu1 %v2906_v29  ;;  %v978_v29 = vld [vmem:[#allocation7 + $0x138] sm:$0xff] }
 0x1de   : > { %v2932_v31 = vpack.c.bf16 %v978_v29, %v975_v28  ;;  %v1330_v28 = vld [vmem:[#allocation8 + $0x48] sm:$0xff] }
 0x1df   : > { %2668 = vmatmul.mubr.msk.f32.vlgmr.msra.gmra.mrb[0].mxu1 %vm756_vm0, %v3956_v21  ;;  %v1334_v29 = vld [vmem:[#allocation8 + $0x68] sm:$0xff] }
 0x1e0   : > { %1051 = vmatprep.mubr.f32.mxu1 %v3567_v0  ;;  %2909 = vmatpush1.bf16.msra.mxu1 %v2908_v33  ;;  %v2962_v33 = vpack.c.bf16 %v980_v32, %v977_v30  ;;  %v1337_v30 = vld [vmem:[#allocation8 + $0x80] sm:$0xff] }
 0x1e1   : > { %2911 = vmatprep.subr.bf16.mxu1 %v2910_v38  ;;  %v984_v38 = vld [vmem:[#allocation7 + $0x168] sm:$0xff] }
 0x1e2   : > { %v2936_v40 = vpack.c.bf16 %v984_v38, %v981_v37  ;;  %v1336_v37 = vld [vmem:[#allocation8 + $0x78] sm:$0xff] }
 0x1e3   : > { %v1340_v38 = vld [vmem:[#allocation8 + $0x98] sm:$0xff] }
 0x1e4   : > { %2913 = vmatpush1.bf16.msra.mxu1 %v2912_v42  ;;  %v2966_v42 = vpack.c.bf16 %v986_v41, %v983_v39  ;;  %v1343_v39 = vld [vmem:[#allocation8 + $0xb0] sm:$0xff] }
 0x1e5   : > { %2915 = vmatprep.subr.bf16.mxu1 %v2914_v47  ;;  %v2486_v47 = vld [vmem:[#allocation11] ss:$0 sm:$0xff] }
 0x1e8   : > { %2917 = vmatpush1.bf16.msra.mxu1 %v2916_v58 }
 0x1e9   : > { %2919 = vmatprep.subr.bf16.mxu1 %v2918_v59 }
 0x1ec   : > { %2921 = vmatpush1.bf16.msra.mxu1 %v2920_v4 }
 0x1ed   : > { %2923 = vmatprep.subr.bf16.mxu1 %v2922_v5 }
 0x1f0   : > { %2925 = vmatpush1.bf16.msra.mxu1 %v2924_v13  ;;  %v1324_v13 = vld [vmem:[#allocation8 + $0x18] sm:$0xff] }
 0x1f1   : > { %2927 = vmatprep.subr.bf16.mxu1 %v2926_v16  ;;  %v1328_v16 = vld [vmem:[#allocation8 + $0x38] sm:$0xff] }
 0x1f4   : > { %v2662_v22 = vpop.f32.mrb[4].mxu0 }
 0x1f5   : > { %v747_v23 = vpop.f32.mrb[5].mxu0 }
 0x1f6   : > { %v2902_v24 = vpack.c.bf16 %v2662_v22, %v747_v23  ;;  %v2958_v22 = vpack.c.bf16 %v974_v12, %v971_v11  ;;  %v2928_v23 = vpack.c.bf16 %v972_v19, %v969_v18  ;;  %v2978_v11 = vpack.c.bf16 %v1325_v3, %v1322_v2  ;;  %v1321_v12 = vld [vmem:[#allocation8] sm:$0xff]  ;;  %v1331_v18 = vld [vmem:[#allocation8 + $0x50] sm:$0xff]  ;;  %v1358_v2 = vld [vmem:[#allocation8 + $0x128] sm:$0xff] }
 0x1f7   : > { %v1361_v3 = vld [vmem:[#allocation8 + $0x140] sm:$0xff] }
 0x1f8   : > { %2903 = vmatprep.subr.bf16.mxu0 %v2902_v24  ;;  %2929 = vmatpush1.bf16.msra.mxu1 %v2928_v23  ;;  %v1335_v23 = vld [vmem:[#allocation8 + $0x70] sm:$0xff] }
 0x1f9   : > { %2905 = vmatpush3.bf16.msra.mxu0 %v2902_v24  ;;  %v976_v24 = vld [vmem:[#allocation7 + $0x128] sm:$0xff] }
 0x1fa   : > { %2939 = vmatprep.subr.bf16.mxu0 %v2938_v34  ;;  %v2930_v27 = vpack.c.bf16 %v979_v26, %v976_v24  ;;  %v1338_v24 = vld [vmem:[#allocation8 + $0x88] sm:$0xff]  ;;  %v2982_v26 = vpack.c.bf16 %v1331_v18, %v1328_v16  ;;  %v1363_v18 = vld [vmem:[#allocation8 + $0x150] sm:$0xff] }
 0x1fc   : > { %2675 = vmatmul.mubr.msk.f32.vlgmr.msra.gmra.mrb[6].mxu0 %vm756_vm0, %v3964_v25  ;;  %2931 = vmatprep.subr.bf16.mxu1 %v2930_v27  ;;  %v1327_v27 = vld [vmem:[#allocation8 + $0x30] sm:$0xff] }
 0x1fd   : > { %2941 = vmatpush3.bf16.msra.mxu0 %v2938_v34  ;;  %2933 = vmatpush1.bf16.msra.mxu1 %v2932_v31  ;;  %v982_v34 = vld [vmem:[#allocation7 + $0x158] sm:$0xff]  ;;  %v3018_v31 = vpack.c.bf16 %v1338_v24, %v1335_v23  ;;  %v2984_v32 = vpack.c.bf16 %v1330_v28, %v1327_v27 }
 0x1fe   : > { %2943 = vmatprep.subr.bf16.mxu0 %v2942_v43  ;;  %v2934_v36 = vpack.c.bf16 %v985_v35, %v982_v34  ;;  %v1344_v34 = vld [vmem:[#allocation8 + $0xb8] sm:$0xff]  ;;  %v2986_v35 = vpack.c.bf16 %v1337_v30, %v1334_v29 }
 0x1ff   : > { %v1368_v24 = vld [vmem:[#allocation8 + $0x178] sm:$0xff] }
 0x200   : > { %2935 = vmatprep.subr.bf16.mxu1 %v2934_v36  ;;  %v1333_v36 = vld [vmem:[#allocation8 + $0x60] sm:$0xff] }
 0x201   : > { %2945 = vmatpush3.bf16.msra.mxu0 %v2942_v43  ;;  %2937 = vmatpush1.bf16.msra.mxu1 %v2936_v40  ;;  %v2988_v41 = vpack.c.bf16 %v1336_v37, %v1333_v36 }
 0x202   : > { %2947 = vmatprep.subr.bf16.mxu0 %v2946_v52 }
 0x205   : > { %2949 = vmatpush3.bf16.msra.mxu0 %v2946_v52  ;;  %v2487_v52 = vld [vmem:[#allocation11 + $0x1] ss:$0 sm:$0xff] }
 0x206   : > { %2951 = vmatprep.subr.bf16.mxu0 %v2950_v62 }
 0x209   : > { %2953 = vmatpush3.bf16.msra.mxu0 %v2950_v62 }
 0x20a   : > { %2955 = vmatprep.subr.bf16.mxu0 %v2954_v8 }
 0x20d   : > { %2957 = vmatpush3.bf16.msra.mxu0 %v2954_v8  ;;  %v1332_v8 = vld [vmem:[#allocation8 + $0x58] sm:$0xff] }
 0x20e   : > { %2959 = vmatprep.subr.bf16.mxu0 %v2958_v22  ;;  %v3014_v19 = vpack.c.bf16 %v1332_v8, %v1329_v7  ;;  %v1359_v7 = vld [vmem:[#allocation8 + $0x130] sm:$0xff] }
 0x211   : > { %2961 = vmatpush3.bf16.msra.mxu0 %v2958_v22  ;;  %v2980_v22 = vpack.c.bf16 %v1324_v13, %v1321_v12  ;;  %v1364_v12 = vld [vmem:[#allocation8 + $0x158] sm:$0xff]  ;;  %v1367_v13 = vld [vmem:[#allocation8 + $0x170] sm:$0xff] }
 0x212   : > { %2963 = vmatprep.subr.bf16.mxu0 %v2962_v33  ;;  %v3006_v16 = vpack.c.bf16 %v1367_v13, %v1364_v12  ;;  %v1698_v12 = vld [vmem:[#allocation10 + $0x38] sm:$0xff]  ;;  %v1701_v13 = vld [vmem:[#allocation10 + $0x50] sm:$0xff] }
 0x215   : > { %2965 = vmatpush3.bf16.msra.mxu0 %v2962_v33  ;;  %v1341_v33 = vld [vmem:[#allocation8 + $0xa0] sm:$0xff] }
 0x216   : > { %2967 = vmatprep.subr.bf16.mxu0 %v2966_v42  ;;  %v3022_v40 = vpack.c.bf16 %v1344_v34, %v1341_v33  ;;  %v2492_v33 = vld [vmem:[#allocation11 + $0x2] ss:$0 sm:$0xff] }
 0x219   : > { %2969 = vmatpush3.bf16.msra.mxu0 %v2966_v42  ;;  %v2990_v42 = vpack.c.bf16 %v1343_v39, %v1340_v38 }
 0x2b2   : > { %v2669_v43 = vpop.f32.mrb[0].mxu1 }
 0x2b3   : > { %v835_v44 = vadd.f32 %v2669_v43, %v3951_v20  ;;  %v829_v45 = vpop.f32.mrb[1].mxu1  ;;  %v1323_v20 = vld [vmem:[#allocation8 + $0x10] sm:$0xff] }
 0x2b4   : > { %v830_v46 = vadd.f32 %v829_v45, %v3949_v17  ;;  %v3010_v5 = vpack.c.bf16 %v1326_v61, %v1323_v20  ;;  %v1339_v43 = vld [vmem:[#allocation8 + $0x90] sm:$0xff]  ;;  %v1353_v20 = vld [vmem:[#allocation8 + $0x100] sm:$0xff] }
 0x2cf   : > { %v2676_v48 = vpop.f32.mrb[6].mxu0 }
 0x2d0   : > { %v920_v49 = vadd.f32 %v2676_v48, %v835_v44  ;;  %v910_v50 = vpop.f32.mrb[7].mxu0  ;;  %v1342_v44 = vld [vmem:[#allocation8 + $0xa8] sm:$0xff] }
 0x2d1   : > { %v919_v53 = vadd.f32 %v910_v50, %v830_v46  ;;  %v2992_v45 = vpack.c.bf16 %v1342_v44, %v1339_v43  ;;  %v1346_v46 = vld [vmem:[#allocation8 + $0xc8] sm:$0xff]  ;;  %v1348_v50 = vld [vmem:[#allocation8 + $0xd8] sm:$0xff]  ;;  %v545_v43 = vld [vmem:[%s3904_s4] sm:$0xff] }
 0x2d2   : > { %v928_v54 = vmul.f32 %v2486_v47, %v920_v49  ;;  %v1345_v49 = vld [vmem:[#allocation8 + $0xc0] sm:$0xff] }
 0x2d3   : > { %v927_v55 = vmul.f32 %v2486_v47, %v919_v53  ;;  %v1349_v47 = vld [vmem:[#allocation8 + $0xe0] sm:$0xff]  ;;  %v2996_v53 = vpack.c.bf16 %v1348_v50, %v1345_v49  ;;  %v1702_v49 = vld [vmem:[#allocation10 + $0x58] sm:$0xff] }
 0x2d4   : > { %v936_v57 = vadd.f32 %v2487_v52, %v928_v54  ;;  %v2994_v48 = vpack.c.bf16 %v1349_v47, %v1346_v46  ;;  %v1350_v54 = vld [vmem:[#allocation8 + $0xe8] sm:$0xff] }
 0x2d5   : > { %v935_v58 = vadd.f32 %v2487_v52, %v927_v55  ;;  %v1347_v52 = vld [vmem:[#allocation8 + $0xd0] sm:$0xff]  ;;  %v1696_v47 = vld [vmem:[#allocation10 + $0x28] sm:$0xff] }
 0x2d6   : > { %v938_v60 = vmax.f32 %v936_v57, 0.0  ;;  %v3026_v55 = vpack.c.bf16 %v1350_v54, %v1347_v52  ;;  %v1352_v57 = vld [vmem:[#allocation8 + $0xf8] sm:$0xff]  ;;  %v1705_v52 = vld [vmem:[#allocation10 + $0x70] sm:$0xff] }
 0x2d7   : > { %v937_v59 = vmax.f32 %v935_v58, 0.0  ;;  %v1355_v58 = vld [vmem:[#allocation8 + $0x110] sm:$0xff] }
 0x2d9   : > { %1052 = vmatmul.mubr.f32.vlgmr.msra.gmra.mrb[2].mxu1 %v937_v59  ;;  %2709 = vmatprep.mubr.f32.mxu0 %v937_v59  ;;  %v2998_v59 = vpack.c.bf16 %v1355_v58, %v1352_v57  ;;  %v1714_v57 = vld [vmem:[#allocation10 + $0xb8] sm:$0xff] }
 0x2da   : > { %2710 = vmatmul.mubr.f32.vlgmr.msra.gmra.mrb[8].mxu0 %v938_v60  ;;  %1057 = vmatprep.mubr.f32.mxu1 %v3567_v0 }
 0x2db   : > { %2716 = vmatprep.mubr.msk.f32.mxu0 %vm756_vm0, %v3938_v14 }
 0x2dd   : > { %1058 = vmatmul.mubr.f32.gmra.mrb[4].mxu1 %v938_v60  ;;  %v1351_v60 = vld [vmem:[#allocation8 + $0xf0] sm:$0xff] }
 0x2de   : > { %2723 = vmatprep.mubr.msk.f32.mxu1 %vm756_vm0, %v3945_v15 }
 0x3ac   : > { %v1053_v17 = vpop.f32.mrb[2].mxu1 }
 0x3ad   : > { %v3975_v62 = vpop.f32.mrb[3].mxu1  ;;  %v2711_v63 = vpop.f32.mrb[8].mxu0 }
 0x3ae   : > { %v1130_v1 = vpop.f32.mrb[9].mxu0 }
 0x3af   : > { %v2974_v4 = vpack.c.bf16 %v2711_v63, %v1130_v1  ;;  %v1356_v63 = vld [vmem:[#allocation8 + $0x118] sm:$0xff] }
 0x3b0   : > { %v1059_v6 = vpop.f32.mrb[4].mxu1  ;;  %v3030_v1 = vpack.c.bf16 %v1356_v63, %v1353_v20 }
 0x3b1   : > { %v2970_v9 = vpack.c.bf16 %v1059_v6, %v1053_v17  ;;  %v3977_v10 = vpop.f32.mrb[5].mxu1  ;;  %2975 = vmatprep.subr.bf16.mxu1 %v2974_v4  ;;  %v1354_v17 = vld [vmem:[#allocation8 + $0x108] sm:$0xff]  ;;  %v1360_v6 = vld [vmem:[#allocation8 + $0x138] sm:$0xff] }
 0x3b2   : > { %2977 = vmatpush3.bf16.msra.mxu1 %v2974_v4  ;;  %v3000_v61 = vpack.c.bf16 %v1354_v17, %v1351_v60  ;;  %v3002_v4 = vpack.c.bf16 %v1361_v3, %v1358_v2  ;;  %v1720_v60 = vld [vmem:[#allocation10 + $0xe8] sm:$0xff] }
 0x3b3   : > { %2971 = vmatprep.subr.bf16.mxu0 %v2970_v9  ;;  %3011 = vmatprep.subr.bf16.mxu1 %v3010_v5 }
 0x3b4   : > { %2973 = vmatpush3.bf16.msra.mxu0 %v2970_v9  ;;  %v1362_v9 = vld [vmem:[#allocation8 + $0x148] sm:$0xff] }
 0x3b5   : > { %2724 = vmatmul.mubr.msk.f32.vlgmr.msra.gmra.mrb[6].mxu1 %vm756_vm0, %v3964_v25  ;;  %2979 = vmatprep.subr.bf16.mxu0 %v2978_v11  ;;  %v3034_v11 = vpack.c.bf16 %v1362_v9, %v1359_v7  ;;  %v1695_v7 = vld [vmem:[#allocation10 + $0x20] sm:$0xff] }
 0x3b6   : > { %3013 = vmatpush3.bf16.msra.mxu1 %v3010_v5  ;;  %v1357_v5 = vld [vmem:[#allocation8 + $0x120] sm:$0xff] }
 0x3b7   : > { %2717 = vmatmul.mubr.msk.f32.vlgmr.msra.gmra.mrb[10].mxu0 %vm756_vm0, %v3956_v21  ;;  %3015 = vmatprep.subr.bf16.mxu1 %v3014_v19  ;;  %v3004_v8 = vpack.c.bf16 %v1360_v6, %v1357_v5  ;;  %v1692_v6 = vld [vmem:[#allocation10 + $0x8] sm:$0xff]  ;;  %v1691_v9 = vld [vmem:[#allocation10] sm:$0xff] }
 0x3b8   : > { %2981 = vmatpush1.bf16.msra.mxu0 %v2980_v22  ;;  %1433 = vmatprep.mubr.f32.mxu0 %v3567_v0  ;;  %v1365_v22 = vld [vmem:[#allocation8 + $0x160] sm:$0xff] }
 0x3b9   : > { %2983 = vmatprep.subr.bf16.mxu0 %v2982_v26  ;;  %v3038_v26 = vpack.c.bf16 %v1368_v24, %v1365_v22  ;;  %v1700_v22 = vld [vmem:[#allocation10 + $0x48] sm:$0xff]  ;;  %v1707_v24 = vld [vmem:[#allocation10 + $0x80] sm:$0xff] }
 0x3ba   : > { %3017 = vmatpush3.bf16.msra.mxu1 %v3014_v19  ;;  %v1366_v19 = vld [vmem:[#allocation8 + $0x168] sm:$0xff] }
 0x3bb   : > { %3019 = vmatprep.subr.bf16.mxu1 %v3018_v31  ;;  %v3008_v23 = vpack.c.bf16 %v1366_v19, %v1363_v18  ;;  %v3054_v18 = vpack.c.bf16 %v1701_v13, %v1698_v12  ;;  %v1697_v19 = vld [vmem:[#allocation10 + $0x30] sm:$0xff]  ;;  %v2498_v13 = vld [vmem:[#allocation11 + $0x4] ss:$0 sm:$0xff] }
 0x3bc   : > { %2985 = vmatpush1.bf16.msra.mxu0 %v2984_v32 }
 0x3bd   : > { %2987 = vmatprep.subr.bf16.mxu0 %v2986_v35  ;;  %v2493_v35 = vld [vmem:[#allocation11 + $0x3] ss:$0 sm:$0xff] }
 0x3be   : > { %3021 = vmatpush3.bf16.msra.mxu1 %v3018_v31 }
 0x3bf   : > { %3023 = vmatprep.subr.bf16.mxu1 %v3022_v40 }
 0x3c0   : > { %2989 = vmatpush1.bf16.msra.mxu0 %v2988_v41 }
 0x3c1   : > { %2991 = vmatprep.subr.bf16.mxu0 %v2990_v42 }
 0x3c2   : > { %3025 = vmatpush3.bf16.msra.mxu1 %v3022_v40  ;;  %v546_v40 = vld [vmem:[%s3904_s4 + $0x8] sm:$0xff]  ;;  %s533_s4 = scalar_lea.vmem [#allocation14], %s2479_s28 }
 0x3c3   : > { %3027 = vmatprep.subr.bf16.mxu1 %v3026_v55  ;;  %s2317_s8 = sshll.u32 %s533_s4, 4  ;;  %s4048_s8 = int_to_ptr.vmem [resolvable:$true] %s2317_s8 }
 0x3c4   : > { %2993 = vmatpush1.bf16.msra.mxu0 %v2992_v45  ;;  %s3473_s27 = scalar_lea.vmem %s4048_s8, 1024  ;;  %p3480_p0 = scmp.lt.s32.totalorder %s4048_s8, %s3478_s12 }
 0x3c5   : > { %2995 = vmatprep.subr.bf16.mxu0 %v2994_v48  ;;  %v1699_v48 = vld [vmem:[#allocation10 + $0x40] sm:$0xff]  ;;  %p3474_p4 = scmp.ne.s32.totalorder %s4048_s8, %s3473_s27 }
 0x3c6   : > { %3029 = vmatpush3.bf16.msra.mxu1 %v3026_v55  ;;  %v3086_v50 = vpack.c.bf16 %v1702_v49, %v1699_v48  ;;  %v1711_v55 = vld [vmem:[#allocation10 + $0xa0] sm:$0xff]  ;;  %v1726_v48 = vld [vmem:[#allocation10 + $0x118] sm:$0xff] }
 0x3c7   : > { %3031 = vmatprep.subr.bf16.mxu1 %v3030_v1  ;;  %v3094_v58 = vpack.c.bf16 %v1714_v57, %v1711_v55  ;;  %v1730_v55 = vld [vmem:[#allocation10 + $0x138] sm:$0xff]  ;;  %v1729_v57 = vld [vmem:[#allocation10 + $0x130] sm:$0xff]  ;;  %p3475_p1 = pnand %p3474_p4, %p4149_p12 }
 0x3c8   : > { %2997 = vmatpush1.bf16.msra.mxu0 %v2996_v53  ;;  %v1708_v53 = vld [vmem:[#allocation10 + $0x88] sm:$0xff] }
 0x3c9   : > { %2999 = vmatprep.subr.bf16.mxu0 %v2998_v59  ;;  %v3090_v54 = vpack.c.bf16 %v1708_v53, %v1705_v52  ;;  %v1717_v59 = vld [vmem:[#allocation10 + $0xd0] sm:$0xff]  ;;  %v1731_v52 = vld [vmem:[#allocation10 + $0x140] sm:$0xff]  ;;  %p3476_p13 = pneg %p3475_p1 }
 0x3ca   : > { %3033 = vmatpush3.bf16.msra.mxu1 %v3030_v1  ;;  %v3098_v17 = vpack.c.bf16 %v1720_v60, %v1717_v59  ;;  %v1732_v59 = vld [vmem:[#allocation10 + $0x148] sm:$0xff] }
 0x3cb   : > { %3035 = vmatprep.subr.bf16.mxu1 %v3034_v11  ;;  %v3106_v60 = vpack.c.bf16 %v1732_v59, %v1729_v57  ;;  %v2169_v57 = vld [vmem:[#allocation13 + $0x38] sm:$0xff] }
 0x3cc   : > { %3001 = vmatpush1.bf16.msra.mxu0 %v3000_v61 }
 0x3cd   : > { %3003 = vmatprep.subr.bf16.mxu0 %v3002_v4 }
 0x3ce   : > { %3037 = vmatpush3.bf16.msra.mxu1 %v3034_v11  ;;  %v1694_v11 = vld [vmem:[#allocation10 + $0x18] sm:$0xff] }
 0x3cf   : > { %3039 = vmatprep.subr.bf16.mxu1 %v3038_v26 }
 0x3d0   : > { %3005 = vmatpush1.bf16.msra.mxu0 %v3004_v8  ;;  %v3050_v8 = vpack.c.bf16 %v1695_v7, %v1692_v6  ;;  %v1738_v6 = vld [vmem:[#allocation10 + $0x178] sm:$0xff] }
 0x3d1   : > { %3007 = vmatprep.subr.bf16.mxu0 %v3006_v16  ;;  %v3052_v16 = vpack.c.bf16 %v1694_v11, %v1691_v9 }
 0x3d2   : > { %3041 = vmatpush3.bf16.msra.mxu1 %v3038_v26  ;;  %v3056_v26 = vpack.c.bf16 %v1700_v22, %v1697_v19  ;;  %v2499_v22 = vld [vmem:[#allocation11 + $0x5] ss:$0 sm:$0xff] }
 0x3d4   : > { %3009 = vmatpush1.bf16.msra.mxu0 %v3008_v23  ;;  %v1704_v23 = vld [vmem:[#allocation10 + $0x68] sm:$0xff] }
 0x488   : > { %v2725_v27 = vpop.f32.mrb[6].mxu1 }
 0x489   : > { %v1280_v28 = vpop.f32.mrb[7].mxu1 }
 0x48a   : > { %v2718_v29 = vpop.f32.mrb[10].mxu0 }
 0x48b   : > { %v1211_v30 = vadd.f32 %v2718_v29, %v3977_v10  ;;  %v1205_v31 = vpop.f32.mrb[11].mxu0  ;;  %v1706_v29 = vld [vmem:[#allocation10 + $0x78] sm:$0xff] }
 0x48c   : > { %v1206_v32 = vadd.f32 %v1205_v31, %v3975_v62  ;;  %v1713_v31 = vld [vmem:[#allocation10 + $0xb0] sm:$0xff] }
 0x48d   : > { %v1290_v34 = vadd.f32 %v2725_v27, %v1211_v30  ;;  %v3058_v27 = vpack.c.bf16 %v1707_v24, %v1704_v23  ;;  %v1710_v30 = vld [vmem:[#allocation10 + $0x98] sm:$0xff] }
 0x48e   : > { %v1289_v36 = vadd.f32 %v1280_v28, %v1206_v32  ;;  %v1703_v28 = vld [vmem:[#allocation10 + $0x60] sm:$0xff] }
 0x48f   : > { %v1298_v37 = vmul.f32 %v2492_v33, %v1290_v34  ;;  %v3060_v32 = vpack.c.bf16 %v1706_v29, %v1703_v28  ;;  %v1709_v34 = vld [vmem:[#allocation10 + $0x90] sm:$0xff] }
 0x490   : > { %v1297_v38 = vmul.f32 %v2492_v33, %v1289_v36  ;;  %v3062_v33 = vpack.c.bf16 %v1713_v31, %v1710_v30  ;;  %v1716_v36 = vld [vmem:[#allocation10 + $0xc8] sm:$0xff] }
 0x491   : > { %v1306_v39 = vadd.f32 %v2493_v35, %v1298_v37  ;;  %v1719_v37 = vld [vmem:[#allocation10 + $0xe0] sm:$0xff] }
 0x492   : > { %v1305_v41 = vadd.f32 %v2493_v35, %v1297_v38  ;;  %v1712_v35 = vld [vmem:[#allocation10 + $0xa8] sm:$0xff] }
 0x493   : > { %v1308_v42 = vadd.f32 %v1306_v39, %v3931_v56  ;;  %v1693_v56 = vld [vmem:[#allocation10 + $0x10] sm:$0xff]  ;;  %v3064_v38 = vpack.c.bf16 %v1712_v35, %v1709_v34  ;;  %v3066_v39 = vpack.c.bf16 %v1719_v37, %v1716_v36 }
 0x494   : > { %v1307_v44 = vadd.f32 %v1305_v41, %v3928_v51  ;;  %v3082_v51 = vpack.c.bf16 %v1696_v47, %v1693_v56  ;;  %v1718_v41 = vld [vmem:[#allocation10 + $0xd8] sm:$0xff]  ;;  %v1724_v56 = vld [vmem:[#allocation10 + $0x108] sm:$0xff]  ;;  %v1723_v47 = vld [vmem:[#allocation10 + $0x100] sm:$0xff] }
 0x495   : > { %v3990_v45 = vadd.f32 %v1308_v42, %v546_v40  ;;  %v1715_v40 = vld [vmem:[#allocation10 + $0xc0] sm:$0xff]  ;;  %v3102_v49 = vpack.c.bf16 %v1726_v48, %v1723_v47 }
 0x496   : > { %v3992_v10 = vadd.f32 %v1307_v44, %v545_v43  ;;  %3083 = vmatprep.subr.bf16.mxu0 %v3082_v51  ;;  %v3068_v42 = vpack.c.bf16 %v1718_v41, %v1715_v40  ;;  %v1722_v43 = vld [vmem:[#allocation10 + $0xf8] sm:$0xff]  ;;  %v1725_v44 = vld [vmem:[#allocation10 + $0x110] sm:$0xff]  ;;  %v2165_v48 = vld [vmem:[#allocation13 + $0x18] sm:$0xff] }
 0x497   : > { %v1320_v46 = vmax.f32 %v3990_v45, 0.0 }
 0x498   : > { %v1319_v62 = vmax.f32 %v3992_v10, 0.0 }
 0x49a   : > { %1434 = vmatmul.mubr.f32.vlgmr.msra.gmra.mrb[12].mxu0 %v1319_v62  ;;  %2758 = vmatprep.mubr.f32.mxu1 %v1319_v62  ;;  %v3070_v62 = vpack.c.bf16 %v1725_v44, %v1722_v43  ;;  %v2505_v44 = vld [vmem:[#allocation11 + $0x7] ss:$0 sm:$0xff] }
 0x49b   : > { %2759 = vmatmul.mubr.f32.vlgmr.msra.gmra.mrb[8].mxu1 %v1320_v46  ;;  %1439 = vmatprep.mubr.f32.mxu0 %v3567_v0 }
 0x49c   : > { %2765 = vmatprep.mubr.msk.f32.mxu1 %vm756_vm0, %v3938_v14  ;;  %3085 = vmatpush3.bf16.msra.mxu0 %v3082_v51 }
 0x49d   : > { %3087 = vmatprep.subr.bf16.mxu0 %v3086_v50 }
 0x49e   : > { %1440 = vmatmul.mubr.f32.gmra.mrb[14].mxu0 %v1320_v46  ;;  %v1721_v46 = vld [vmem:[#allocation10 + $0xf0] sm:$0xff] }
 0x49f   : > { %v3072_v51 = vpack.c.bf16 %v1724_v56, %v1721_v46 }
 0x4a0   : > { %3089 = vmatpush3.bf16.msra.mxu0 %v3086_v50  ;;  %v1728_v50 = vld [vmem:[#allocation10 + $0x128] sm:$0xff] }
 0x4a1   : > { %3091 = vmatprep.subr.bf16.mxu0 %v3090_v54  ;;  %v3074_v53 = vpack.c.bf16 %v1731_v52, %v1728_v50 }
 0x4a4   : > { %3093 = vmatpush3.bf16.msra.mxu0 %v3090_v54  ;;  %v1727_v54 = vld [vmem:[#allocation10 + $0x120] sm:$0xff] }
 0x4a5   : > { %3095 = vmatprep.subr.bf16.mxu0 %v3094_v58 }
 0x4a8   : > { %3097 = vmatpush3.bf16.msra.mxu0 %v3094_v58  ;;  %v3076_v58 = vpack.c.bf16 %v1730_v55, %v1727_v54  ;;  %v2164_v54 = vld [vmem:[#allocation13 + $0x10] sm:$0xff]  ;;  %v2167_v55 = vld [vmem:[#allocation13 + $0x28] sm:$0xff] }
 0x4a9   : > { %3099 = vmatprep.subr.bf16.mxu0 %v3098_v17 }
 0x4ac   : > { %3101 = vmatpush3.bf16.msra.mxu0 %v3098_v17  ;;  %v1734_v17 = vld [vmem:[#allocation10 + $0x158] sm:$0xff] }
 0x4ad   : > { %3103 = vmatprep.subr.bf16.mxu0 %v3102_v49 }
 0x4b0   : > { %3105 = vmatpush3.bf16.msra.mxu0 %v3102_v49 }
 0x4b1   : > { %3107 = vmatprep.subr.bf16.mxu0 %v3106_v60 }
 0x4b4   : > { %3109 = vmatpush3.bf16.msra.mxu0 %v3106_v60  ;;  %v3130_v60 = vpack.c.bf16 %v2169_v57, %v2167_v55 }
 0x56d   : > { %v1435_v20 = vpop.f32.mrb[12].mxu0 }
 0x56e   : > { %v3999_v61 = vpop.f32.mrb[13].mxu0  ;;  %v2760_v63 = vpop.f32.mrb[8].mxu1 }
 0x56f   : > { %v1512_v1 = vpop.f32.mrb[9].mxu1 }
 0x570   : > { %v3046_v2 = vpack.c.bf16 %v2760_v63, %v1512_v1  ;;  %v1733_v1 = vld [vmem:[#allocation10 + $0x150] sm:$0xff] }
 0x571   : > { %v1441_v3 = vpop.f32.mrb[14].mxu0 }
 0x572   : > { %v3042_v4 = vpack.c.bf16 %v1441_v3, %v1435_v20  ;;  %v4001_v5 = vpop.f32.mrb[15].mxu0  ;;  %v1737_v20 = vld [vmem:[#allocation10 + $0x170] sm:$0xff]  ;;  %v1735_v3 = vld [vmem:[#allocation10 + $0x160] sm:$0xff] }
 0x573   : > { %v3078_v63 = vpack.c.bf16 %v1737_v20, %v1734_v17  ;;  %v3110_v7 = vpack.c.bf16 %v1738_v6, %v1735_v3  ;;  %v2168_v17 = vld [vmem:[#allocation13 + $0x30] sm:$0xff]  ;;  %v2171_v20 = vld [vmem:[#allocation13 + $0x48] sm:$0xff] }
 0x574   : > { %3043 = vmatprep.subr.bf16.mxu1 %v3042_v4  ;;  %v2172_v6 = vld [vmem:[#allocation13 + $0x50] sm:$0xff] }
 0x575   : > { %3045 = vmatpush3.bf16.msra.mxu1 %v3042_v4  ;;  %3111 = vmatprep.subr.bf16.mxu0 %v3110_v7 }
 0x576   : > { %3047 = vmatprep.subr.bf16.mxu1 %v3046_v2  ;;  %3113 = vmatpush3.bf16.msra.mxu0 %v3110_v7  ;;  %v2175_v7 = vld [vmem:[#allocation13 + $0x68] sm:$0xff] }
 0x578   : > { %2766 = vmatmul.mubr.msk.f32.vlgmr.msra.gmra.mrb[10].mxu1 %vm756_vm0, %v3956_v21 }
 0x579   : > { %3049 = vmatpush3.bf16.msra.mxu1 %v3046_v2  ;;  %2772 = vmatprep.mubr.msk.f32.mxu1 %vm756_vm0, %v3945_v15  ;;  %v1736_v2 = vld [vmem:[#allocation10 + $0x168] sm:$0xff] }
 0x57a   : > { %3051 = vmatprep.subr.bf16.mxu1 %v3050_v8  ;;  %v3080_v4 = vpack.c.bf16 %v1736_v2, %v1733_v1  ;;  %v2064_v1 = vld [vmem:[%s4146_s16 + $0x18] sm:$0xff] }
 0x57c   : > { %2773 = vmatmul.mubr.msk.f32.vlgmr.msra.gmra.mrb[12].mxu1 %vm756_vm0, %v3964_v25 }
 0x57d   : > { %3053 = vmatpush1.bf16.msra.mxu1 %v3052_v16  ;;  %1803 = vmatprep.mubr.f32.mxu1 %v3567_v0 }
 0x57e   : > { %3055 = vmatprep.subr.bf16.mxu1 %v3054_v18 }
 0x581   : > { %3057 = vmatpush1.bf16.msra.mxu1 %v3056_v26 }
 0x582   : > { %3059 = vmatprep.subr.bf16.mxu1 %v3058_v27 }
 0x585   : > { %3061 = vmatpush1.bf16.msra.mxu1 %v3060_v32 }
 0x586   : > { %3063 = vmatprep.subr.bf16.mxu1 %v3062_v33 }
 0x589   : > { %3065 = vmatpush1.bf16.msra.mxu1 %v3064_v38 }
 0x58a   : > { %3067 = vmatprep.subr.bf16.mxu1 %v3066_v39 }
 0x58d   : > { %3069 = vmatpush1.bf16.msra.mxu1 %v3068_v42  ;;  %v2504_v42 = vld [vmem:[#allocation11 + $0x6] ss:$0 sm:$0xff] }
 0x58e   : > { %3071 = vmatprep.subr.bf16.mxu1 %v3070_v62 }
 0x591   : > { %3073 = vmatpush1.bf16.msra.mxu1 %v3072_v51  ;;  %v2163_v51 = vld [vmem:[#allocation13 + $0x8] sm:$0xff] }
 0x592   : > { %3075 = vmatprep.subr.bf16.mxu1 %v3074_v53  ;;  %v3126_v52 = vpack.c.bf16 %v2165_v48, %v2163_v51  ;;  %v2162_v53 = vld [vmem:[#allocation13] sm:$0xff] }
 0x593   : > { %v3128_v59 = vpack.c.bf16 %v2164_v54, %v2162_v53 }
 0x595   : > { %3077 = vmatpush1.bf16.msra.mxu1 %v3076_v58  ;;  %v2062_v58 = vld [vmem:[%s4146_s16 + $0x8] sm:$0xff] }
 0x596   : > { %3079 = vmatprep.subr.bf16.mxu1 %v3078_v63  ;;  %v2173_v63 = vld [vmem:[#allocation13 + $0x58] sm:$0xff] }
 0x597   : > { %v3134_v3 = vpack.c.bf16 %v2173_v63, %v2171_v20 }
 0x599   : > { %3081 = vmatpush1.bf16.msra.mxu1 %v3080_v4  ;;  %v2170_v4 = vld [vmem:[#allocation13 + $0x40] sm:$0xff] }
 0x64b   : > { %v2767_v8 = vpop.f32.mrb[10].mxu1 }
 0x64c   : > { %v1593_v9 = vadd.f32 %v2767_v8, %v4001_v5  ;;  %v1587_v11 = vpop.f32.mrb[11].mxu1  ;;  %v2177_v8 = vld [vmem:[#allocation13 + $0x78] sm:$0xff] }
 0x64d   : > { %v1588_v12 = vadd.f32 %v1587_v11, %v3999_v61  ;;  %v3138_v11 = vpack.c.bf16 %v2177_v8, %v2175_v7 }
 0x64f   : > { %v2774_v16 = vpop.f32.mrb[12].mxu1 }
 0x650   : > { %v1672_v18 = vadd.f32 %v2774_v16, %v1593_v9  ;;  %v1662_v19 = vpop.f32.mrb[13].mxu1  ;;  %v3136_v9 = vpack.c.bf16 %v2172_v6, %v2170_v4  ;;  %v2179_v16 = vld [vmem:[#allocation13 + $0x88] sm:$0xff] }
 0x651   : > { %v1671_v23 = vadd.f32 %v1662_v19, %v1588_v12  ;;  %v2174_v12 = vld [vmem:[#allocation13 + $0x60] sm:$0xff] }
 0x652   : > { %v1680_v24 = vmul.f32 %v2498_v13, %v1672_v18  ;;  %v2181_v18 = vld [vmem:[#allocation13 + $0x98] sm:$0xff] }
 0x653   : > { %v1679_v26 = vmul.f32 %v2498_v13, %v1671_v23  ;;  %v2176_v13 = vld [vmem:[#allocation13 + $0x70] sm:$0xff]  ;;  %v2178_v23 = vld [vmem:[#allocation13 + $0x80] sm:$0xff] }
 0x654   : > { %v1688_v27 = vadd.f32 %v2499_v22, %v1680_v24  ;;  %v3140_v19 = vpack.c.bf16 %v2176_v13, %v2174_v12  ;;  %v2180_v24 = vld [vmem:[#allocation13 + $0x90] sm:$0xff] }
 0x655   : > { %v1687_v28 = vadd.f32 %v2499_v22, %v1679_v26  ;;  %v3142_v22 = vpack.c.bf16 %v2181_v18, %v2179_v16  ;;  %v2183_v26 = vld [vmem:[#allocation13 + $0xa8] sm:$0xff] }
 0x656   : > { %v1690_v30 = vmax.f32 %v1688_v27, 0.0  ;;  %v2185_v27 = vld [vmem:[#allocation13 + $0xb8] sm:$0xff] }
 0x657   : > { %v1689_v29 = vmax.f32 %v1687_v28, 0.0  ;;  %v3144_v28 = vpack.c.bf16 %v2180_v24, %v2178_v23 }
 0x659   : > { %1804 = vmatmul.mubr.f32.vlgmr.msra.gmra.mrb[14].mxu1 %v1689_v29  ;;  %2807 = vmatprep.mubr.f32.mxu0 %v1689_v29  ;;  %v3146_v29 = vpack.c.bf16 %v2185_v27, %v2183_v26 }
 0x65a   : > { %2808 = vmatmul.mubr.f32.vlgmr.msra.gmra.mrb[16].mxu0 %v1690_v30  ;;  %1809 = vmatprep.mubr.f32.mxu1 %v3567_v0 }
 0x65b   : > { %2814 = vmatprep.mubr.msk.f32.mxu0 %vm756_vm0, %v3938_v14  ;;  %v2061_v14 = vld [vmem:[%s4146_s16] sm:$0xff] }
 0x65d   : > { %1810 = vmatmul.mubr.f32.gmra.mrb[16].mxu1 %v1690_v30  ;;  %v2182_v30 = vld [vmem:[#allocation13 + $0xa0] sm:$0xff] }
 0x65e   : > { %2821 = vmatprep.mubr.msk.f32.mxu1 %vm756_vm0, %v3945_v15 }
 0x72c   : > { %v1805_v61 = vpop.f32.mrb[14].mxu1 }
 0x72d   : > { %v1807_v5 = vpop.f32.mrb[15].mxu1  ;;  %v2809_v31 = vpop.f32.mrb[16].mxu0 }
 0x72e   : > { %v1882_v32 = vpop.f32.mrb[17].mxu0 }
 0x72f   : > { %v3118_v33 = vpack.c.bf16 %v2809_v31, %v1882_v32  ;;  %v2189_v31 = vld [vmem:[#allocation13 + $0xd8] sm:$0xff] }
 0x730   : > { %v1811_v34 = vpop.f32.mrb[16].mxu1 }
 0x731   : > { %v3114_v35 = vpack.c.bf16 %v1811_v34, %v1805_v61  ;;  %v1813_v36 = vpop.f32.mrb[17].mxu1  ;;  %3119 = vmatprep.subr.bf16.mxu1 %v3118_v33  ;;  %v2184_v61 = vld [vmem:[#allocation13 + $0xb0] sm:$0xff]  ;;  %v2186_v34 = vld [vmem:[#allocation13 + $0xc0] sm:$0xff] }
 0x732   : > { %3121 = vmatpush3.bf16.msra.mxu1 %v3118_v33  ;;  %v3148_v32 = vpack.c.bf16 %v2184_v61, %v2182_v30 }
 0x733   : > { %3115 = vmatprep.subr.bf16.mxu0 %v3114_v35 }
 0x734   : > { %3117 = vmatpush3.bf16.msra.mxu0 %v3114_v35  ;;  %v2188_v35 = vld [vmem:[#allocation13 + $0xd0] sm:$0xff] }
 0x735   : > { %2822 = vmatmul.mubr.msk.f32.vlgmr.msra.gmra.mrb[18].mxu1 %vm756_vm0, %v3964_v25 }
 0x736   : > { %2828 = vmatprep.mubr.msk.f32.mxu1 %vm756_vm0, %v2061_v14  ;;  %v2193_v14 = vld [vmem:[#allocation13 + $0xf8] sm:$0xff] }
 0x737   : > { %2815 = vmatmul.mubr.msk.f32.vlgmr.msra.gmra.mrb[18].mxu0 %vm756_vm0, %v3956_v21 }
 0x808   : > { %v2823_v15 = vpop.f32.mrb[18].mxu1 }
 0x809   : > { %v2032_v37 = vpop.f32.mrb[19].mxu1 }
 0x80a   : > { %v2816_v38 = vpop.f32.mrb[18].mxu0 }
 0x80b   : > { %v1963_v39 = vadd.f32 %v2816_v38, %v1813_v36  ;;  %v1957_v40 = vpop.f32.mrb[19].mxu0  ;;  %v2191_v36 = vld [vmem:[#allocation13 + $0xe8] sm:$0xff]  ;;  %v2190_v38 = vld [vmem:[#allocation13 + $0xe0] sm:$0xff] }
 0x80c   : > { %v1958_v41 = vadd.f32 %v1957_v40, %v1807_v5  ;;  %v2187_v5 = vld [vmem:[#allocation13 + $0xc8] sm:$0xff] }
 0x80d   : > { %v2042_v43 = vadd.f32 %v2823_v15, %v1963_v39  ;;  %v3150_v33 = vpack.c.bf16 %v2189_v31, %v2187_v5  ;;  %v3152_v15 = vpack.c.bf16 %v2188_v35, %v2186_v34  ;;  %v2192_v39 = vld [vmem:[#allocation13 + $0xf0] sm:$0xff] }
 0x80e   : > { %v2041_v62 = vadd.f32 %v2032_v37, %v1958_v41  ;;  %v3154_v37 = vpack.c.bf16 %v2193_v14, %v2191_v36  ;;  %v3156_v40 = vpack.c.bf16 %v2192_v39, %v2190_v38 }
 0x80f   : > { %v2050_v25 = vmul.f32 %v2504_v42, %v2042_v43 }
 0x810   : > { %v2049_v46 = vmul.f32 %v2504_v42, %v2041_v62  ;;  %v2196_v62 = vlaneseq }
 0x811   : > { %v2058_v56 = vadd.f32 %v2505_v44, %v2050_v25 }
 0x812   : > { %v2057_v21 = vadd.f32 %v2505_v44, %v2049_v46  ;;  %v2197_v25 = vshrl.u32 %v2196_v62, 7 }
 0x813   : > { %v2060_v47 = vadd.f32 %v2058_v56, %v3990_v45  ;;  %v2063_v45 = vld [vmem:[%s4146_s16 + $0x10] sm:$0xff]  ;;  %v2194_v56 = vld [vmem:[%s4147_s20] sm:$0x3]  ;;  %s3479_s20 = scalar_lea.vmem %s3478_s12, 2048 }
 0x814   : > { %v2059_v49 = vadd.f32 %v2057_v21, %v3992_v10  ;;  %v2166_v10 = vld [vmem:[#allocation13 + $0x20] sm:$0xff]  ;;  %v2198_v46 = vsub.s32 0, %v2197_v25  ;;  %v2202_v21 = vsub.s32 1, %v2197_v25  ;;  %p3481_p2 = scmp.lt.s32.totalorder %s3479_s20, %s3473_s27 }
 0x815   : > { %v3132_v2 = vpack.c.bf16 %v2168_v17, %v2166_v10 }
 0x816   : > { %v3122_v50 = vpack.c.bf16 %v2060_v47, %v2059_v49  ;;  %v2199_v47 = vrot.slane %v2194_v56, %v2198_v46  ;;  %v2203_v51 = vrot.slane %v2194_v56, %v2202_v21  ;;  %p3482_p8 = por %p3481_p2, %p3480_p0 }
 0x818   : > { %3123 = vmatprep.subr.bf16.mxu1 %v3122_v50  ;;  %p3483_p6 = pnand %p3482_p8, %p3476_p13 }
 0x819   : > { %3125 = vmatpush3.bf16.msra.mxu1 %v3122_v50 }
 0x81a   : > { %3127 = vmatprep.subr.bf16.mxu1 %v3126_v52 }
 0x81c   : > { %2829 = vmatmul.mubr.msk.f32.vlgmr.msra.gmra.mrb[20].mxu1 %vm756_vm0, %v2062_v58 }
 0x81d   : > { %2831 = vmatprep.mubr.msk.f32.mxu1 %vm756_vm0, %v2063_v45  ;;  %3129 = vmatpush1.bf16.msra.mxu1 %v3128_v59 }
 0x81e   : > { %3131 = vmatprep.subr.bf16.mxu1 %v3130_v60 }
 0x820   : > { %2832 = vmatmul.mubr.msk.f32.gmra.mrb[22].mxu1 %vm756_vm0, %v2064_v1 }
 0x821   : > { %3133 = vmatpush1.bf16.msra.mxu1 %v3132_v2  ;;  %2270 = vmatprep.mubr.f32.mxu1 %v3567_v0 }
 0x822   : > { %3135 = vmatprep.subr.bf16.mxu1 %v3134_v3 }
 0x825   : > { %3137 = vmatpush1.bf16.msra.mxu1 %v3136_v9 }
 0x826   : > { %3139 = vmatprep.subr.bf16.mxu1 %v3138_v11 }
 0x829   : > { %3141 = vmatpush1.bf16.msra.mxu1 %v3140_v19 }
 0x82a   : > { %3143 = vmatprep.subr.bf16.mxu1 %v3142_v22 }
 0x82d   : > { %3145 = vmatpush1.bf16.msra.mxu1 %v3144_v28 }
 0x82e   : > { %3147 = vmatprep.subr.bf16.mxu1 %v3146_v29 }
 0x831   : > { %3149 = vmatpush1.bf16.msra.mxu1 %v3148_v32 }
 0x832   : > { %3151 = vmatprep.subr.bf16.mxu1 %v3150_v33 }
 0x835   : > { %3153 = vmatpush1.bf16.msra.mxu1 %v3152_v15 }
 0x836   : > { %3155 = vmatprep.subr.bf16.mxu1 %v3154_v37 }
 0x839   : > { %3157 = vmatpush1.bf16.msra.mxu1 %v3156_v40 }
 0x8ef   : > { %v2830_v41 = vpop.f32.mrb[20].mxu1 }
 0x8f0   : > { %v2143_v42 = vpop.f32.mrb[21].mxu1 }
 0x8f1   : > { %2271 = vmatmul.mubr.f32.vlgmr.msra.gmra.mrb[24].mxu1 %v2143_v42 }
 0x8f2   : > { %2276 = vmatprep.mubr.f32.mxu1 %v3567_v0 }
 0x8f3   : > { %v2833_v43 = vpop.f32.mrb[22].mxu1 }
 0x8f4   : > { %v2153_v44 = vpop.f32.mrb[23].mxu1 }
 0x8f5   : > { %2277 = vmatmul.mubr.f32.gmra.mrb[26].mxu1 %v2830_v41 }
 0x8f6   : > { %2282 = vmatprep.mubr.f32.mxu1 %v3567_v0 }
 0x8f9   : > { %2283 = vmatmul.mubr.f32.gmra.mrb[28].mxu1 %v2153_v44 }
 0x8fa   : > { %2288 = vmatprep.mubr.f32.mxu1 %v3567_v0 }
 0x8fd   : > { %2289 = vmatmul.mubr.f32.gmra.mrb[30].mxu1 %v2833_v43 }
 0x9c4   : > { %v2272_v48 = vpop.f32.mrb[24].mxu1 }
 0x9c5   : > { %v2273_v49 = vadd.f32 %v2272_v48, %v2199_v47  ;;  %v2274_v50 = vpop.f32.mrb[25].mxu1 }
 0x9c6   : > { %v2275_v52 = vadd.f32 %v2274_v50, %v2203_v51 }
 0x9c7   : > { %2295 = vst [vmem:[%s533_s4] sm:$0xff] %v2273_v49 }
 0x9c8   : > { %2296 = vst [vmem:[%s533_s4 + $0x8] sm:$0xff] %v2275_v52  ;;  %v2278_v0 = vpop.f32.mrb[26].mxu1 }
 0x9c9   : > { %v2279_v53 = vadd.f32 %v2278_v0, %v2199_v47  ;;  %v2280_v54 = vpop.f32.mrb[27].mxu1 }
 0x9ca   : > { %v2281_v55 = vadd.f32 %v2280_v54, %v2203_v51 }
 0x9cb   : > { %2297 = vst [vmem:[%s533_s4 + $0x10] sm:$0xff] %v2279_v53 }
 0x9cc   : > { %2298 = vst [vmem:[%s533_s4 + $0x18] sm:$0xff] %v2281_v55  ;;  %v2284_v57 = vpop.f32.mrb[28].mxu1 }
 0x9cd   : > { %v2285_v58 = vadd.f32 %v2284_v57, %v2199_v47  ;;  %v2286_v59 = vpop.f32.mrb[29].mxu1 }
 0x9ce   : > { %v2287_v45 = vadd.f32 %v2286_v59, %v2203_v51 }
 0x9cf   : > { %2299 = vst [vmem:[%s533_s4 + $0x20] sm:$0xff] %v2285_v58 }
 0x9d0   : > { %2300 = vst [vmem:[%s533_s4 + $0x28] sm:$0xff] %v2287_v45  ;;  %v2290_v60 = vpop.f32.mrb[30].mxu1 }
 0x9d1   : > { %v2291_v10 = vadd.f32 %v2290_v60, %v2199_v47  ;;  %v2292_v17 = vpop.f32.mrb[31].mxu1 }
 0x9d2   : > { %v2293_v20 = vadd.f32 %v2292_v17, %v2203_v51 }
 0x9d3   : > { %2301 = vst [vmem:[%s533_s4 + $0x30] sm:$0xff] %v2291_v10 }
 0x9d4   : > { %2302 = vst [vmem:[%s533_s4 + $0x38] sm:$0xff] %v2293_v20 }
 0x9d5   : > { %3486 = shalt.err (!%p3483_p6)
}
 0x9d6   : > { %s3487_s28 = scalar_lea.hbm %s4053_s29, 1024  ;;  %s3491_s18 = scalar_lea.hbm %s4148_s14, 2048 }
 0x9d7   : > { %p3488_p10 = scmp.ne.s32.totalorder %s4053_s29, %s3487_s28  ;;  %p3492_p5 = scmp.lt.u32.totalorder %s4053_s29, %s4148_s14 }
 0x9d8   : > { %p3493_p9 = scmp.lt.u32.totalorder %s3491_s18, %s3487_s28  ;;  %p3495_p4 = scmp.lt.u32.totalorder %s3487_s28, %s4053_s29 }
 0x9d9   : > { %p3489_p11 = pnand %p3488_p10, %p4149_p12 }
 0x9da   : > { %p3494_p7 = por %p3493_p9, %p3492_p5 }
 0x9db   : > { %p3490_p3 = pneg %p3489_p11 }
 0x9dc   : > { %p3496_p1 = por %p3495_p4, %p3494_p7 }
 0x9de   : > { %p3497_p13 = pnand %p3496_p1, %p3490_p3 }
 0x9e0   : > { %3500 = shalt.err (!%p3497_p13)
}
 0x9e1   : > { %s3569_s27 = smov 256   ;;  %s3570_s12 = smov 16  }
 0x9e2   : > { %3184 = dma.vmem_to_hbm [thread:$0]  (%p4149_p12), %s4048_s8, 1024, %s4053_s29, %s2304_s19, %s3569_s27, %s3569_s27, %s3570_s12  }
 0x9e3 PF: > { %s2332_s20 = sand.u32 1, %s3539_s21   ;;  %p4150_p0 = scmp.ne.s32.totalorder %s4136_s9, 0 }
 0x9e4   : > { %p4151_p2 = scmp.ge.s32.totalorder %s3551_s24, 2  ;;  %s2333_s28 = scalar_lea.sflag [#allocation4], %s2332_s20 }
 0x9e6   : > { %p3210_p8 = pnand %p4151_p2, %p4150_p0 }
 0x9e8   : > { %3534 = dma.done.wait (!%p3210_p8), %s2333_s28, 1024  }
 0x9e9   : > { %3536 = vsyncadd (!%p3210_p8), %s2333_s28, 4294966272  ;;  %p28_p6 = scmp.ge.s32.totalorder %s3827_s25, 4   ;;  %s4152_s21 = smov %s3543_s22 }
 0x9ea   : > { %s4153_s22 = smov %s3547_s23  ;;  %s4154_s23 = smov %s3839_s2 }
 0x9eb   : > { %s4155_s24 = smov %s3827_s25  ;;  %30 = sbr.rel (!%p28_p6) target bundleno = 15 (0xf), region = 147 }
 0x9f2   :  { %2338 = vsyncpa [#allocation3], 1 }
 0x9f3   :  { %2340 = vsyncpa [#allocation3 + $0x1], 1 }
 0x9f4   :  { %2341 = vsyncpa [#allocation6], 1 }
 0x9f5   :  { %2342 = vsyncpa [#allocation9], 1 }
 0x9f6   :  { %2343 = vsyncpa [#allocation12], 1 }
 0x9f7   :  { %2344 = vsyncpa [#allocation4], 1 }
 0x9f8   :  { %2346 = vsyncpa [#allocation4 + $0x1], 1 }

</bundles_post_ra>
